<compile_context>
chip_gen: v6e
topology: v6e:2x2x1
jax: 0.10.0
libtpu: 0.0.40
codegen_flags: <defaults>
</compile_context>

<pallas_src>
import functools
import math

import jax
import jax.numpy as jnp
from jax.experimental import pallas as pl
from jax.experimental.pallas import tpu as pltpu

# ---- model hyper-parameters (static) -----------------------------------------
D_MODEL = 32
D_INNER = 64
N_HEAD = 4
D_K = 8
D_V = 8
LN_EPS = 1e-6

# ---- packed-parameter layout ---------------------------------------------------
# All fan_in == d_model weight matrices share one (D_MODEL, N_SLOTS*128) slab; every
# matrix sits at a 128-lane-aligned column slot (static offsets -> aligned lane slices).
_SLOT = 128
(_S_WQ1, _S_WK1, _S_WV1, _S_WO1,
 _S_WQ2, _S_WK2, _S_WV2, _S_WO2, _S_W1) = range(9)
_N_WSLOTS = 9

# Bias / LayerNorm vectors: one 128-lane row each in a (16, 128) slab.
(_R_BQ1, _R_BK1, _R_BV1, _R_BO1, _R_G1, _R_BE1,
 _R_BQ2, _R_BK2, _R_BV2, _R_BO2, _R_G2, _R_BE2,
 _R_BFF1, _R_BFF2, _R_G3, _R_BE3) = range(16)
_N_BROWS = 16


# ---- in-kernel helpers (traced inside the Pallas body) -------------------------
def _layer_norm(v, gamma, beta):
    # Single-pass LayerNorm: var = E[x^2] - mu^2 (one fewer XLU reduction per LN,
    # no (v - mu)^2 pass).  Constant 1/D instead of jnp.mean.
    inv_d = 1.0 / D_MODEL
    mu = jnp.sum(v, axis=-1, keepdims=True) * inv_d
    ms = jnp.sum(v * v, axis=-1, keepdims=True) * inv_d
    var = jnp.maximum(ms - mu * mu, 0.0)
    return (v - mu) * jax.lax.rsqrt(var + LN_EPS) * gamma + beta


# ---- Pallas kernel: full decoder layer for B_TILE batch elements ----------------
def decoder_layer_kernel(dec_ref, enc_ref, w32_ref, w2_ref, bias_ref, out_ref,
                         *, b_tile, len_dec, len_enc, approx_recip):
    W = w32_ref[...]        # (D_MODEL, _N_WSLOTS*128)  packed weight slab (f32)
    Bv = bias_ref[...]      # (_N_BROWS, 128)           packed bias / LN slab (f32)

    def wcol(slot, width=D_MODEL):                    # static 128-aligned column slot
        return W[:, slot * _SLOT: slot * _SLOT + width]

    def brow(row, width=D_MODEL):                     # static bias row -> (1, width)
        return Bv[row:row + 1, 0:width]

    # bf16 in HBM -> f32 for all in-kernel math (safe on v5e: no bf16 VPU/EUP there).
    x = dec_ref[...].astype(jnp.float32)    # (Rq, D_MODEL), Rq = b_tile * len_dec
    enc = enc_ref[...].astype(jnp.float32)  # (Rk, D_MODEL), Rk = b_tile * len_enc

    def mha(xq, xkv, lq, lk, s_wq, r_bq, s_wk, r_bk, s_wv, r_bv, s_wo, r_bo):
        """Multi-head attention + output projection (per-head weight slicing,
        per-head output-projection accumulation: no activation lane slices, no concat)."""
        wq, wk, wv, wo = wcol(s_wq), wcol(s_wk), wcol(s_wv), wcol(s_wo)
        bq, bk, bv = brow(r_bq), brow(r_bk), brow(r_bv)
        acc = jnp.zeros((b_tile * lq, D_MODEL), jnp.float32)
        for h in range(N_HEAD):                       # static, small (N_HEAD = 4)
            ck = slice(h * D_K, (h + 1) * D_K)        # weight slices only (32x8 / 8x32)
            cv = slice(h * D_V, (h + 1) * D_V)
            qh = (jnp.dot(xq, wq[:, ck], preferred_element_type=jnp.float32)
                  + bq[:, ck]).reshape(b_tile, lq, D_K)
            kh = (jnp.dot(xkv, wk[:, ck], preferred_element_type=jnp.float32)
                  + bk[:, ck]).reshape(b_tile, lk, D_K)
            vh = (jnp.dot(xkv, wv[:, cv], preferred_element_type=jnp.float32)
                  + bv[:, cv]).reshape(b_tile, lk, D_V)
            # batched over the B_TILE axis (single batch dim)
            s = jnp.einsum('bqd,bkd->bqk', qh, kh, preferred_element_type=jnp.float32)
            # TODO(synk): apply slf_attn_mask / dec_enc_attn_mask here when provided.
            s = s - jnp.max(s, axis=-1, keepdims=True)
            p = jnp.exp(s)
            denom = jnp.sum(p, axis=-1, keepdims=True)
            if approx_recip:
                p = p * pl.reciprocal(denom, approx=True)   # EUP slot
            else:
                p = p / denom                               # exact (parity tests)
            oh = jnp.einsum('bqk,bkd->bqd', p, vh, preferred_element_type=jnp.float32)
            # accumulate the output projection per head; wo row slice is sublane-aligned
            acc = acc + jnp.dot(oh.reshape(b_tile * lq, D_V), wo[cv, :],
                                preferred_element_type=jnp.float32)
        return acc + brow(r_bo)

    # ---- self attention + add & norm ----
    a = mha(x, x, len_dec, len_dec,
            _S_WQ1, _R_BQ1, _S_WK1, _R_BK1, _S_WV1, _R_BV1, _S_WO1, _R_BO1)
    # dropout: eval mode -> identity
    y = _layer_norm(a + x, brow(_R_G1), brow(_R_BE1))

    # ---- encoder-decoder (cross) attention + add & norm ----
    a = mha(y, enc, len_dec, len_enc,
            _S_WQ2, _R_BQ2, _S_WK2, _R_BK2, _S_WV2, _R_BV2, _S_WO2, _R_BO2)
    y = _layer_norm(a + y, brow(_R_G2), brow(_R_BE2))

    # ---- position-wise feed-forward + add & norm ----
    h1 = jnp.maximum(
        jnp.dot(y, wcol(_S_W1, D_INNER), preferred_element_type=jnp.float32)
        + brow(_R_BFF1, D_INNER), 0.0)
    h2 = jnp.dot(h1, w2_ref[...], preferred_element_type=jnp.float32) + brow(_R_BFF2)
    out_ref[...] = _layer_norm(h2 + y, brow(_R_G3), brow(_R_BE3)).astype(out_ref.dtype)


# ---- wrapper --------------------------------------------------------------------
def _choose_b_tile(batch, len_dec, len_enc):
    """Pick batch-elements-per-grid-step.

    Targets >= 2048 flattened rows per step (amortizes ~0.35 us/step pipeline
    overhead), caps at 8192 rows (VMEM budget incl. v7x's 64 MiB), keeps the grid
    >= 2 steps when possible (v7x has 2 TensorCores), and only returns tiles whose
    row count is a multiple of 16 (bf16 sublane packing) or the full extent so the
    BlockSpec is always legal."""
    rows_target = 2048
    max_rows = 8192
    divisors = [d for d in range(1, batch + 1) if batch % d == 0]

    def valid(d):
        if d == batch:                       # full-extent blocks are always legal
            return True
        return (d * len_dec) % 16 == 0 and (d * len_enc) % 16 == 0

    cands = [d for d in divisors if valid(d)]
    fitting = [d for d in cands if d * max(len_dec, len_enc) <= max_rows]
    if fitting:
        cands = fitting
    # prefer >= 2 grid steps so both v7x TensorCores get work
    multi = [d for d in cands if batch // d >= 2]
    pool = multi if multi else cands
    for d in pool:                           # smallest divisor reaching the row target
        if d * len_dec >= rows_target:
            return d
    return pool[-1]                          # largest valid divisor otherwise


def decoder_layer(dec_input, enc_output, packed_params, *, b_tile=None,
                  io_dtype=jnp.bfloat16, approx_recip=True):
    """dec_input: (B, L_dec, d_model), enc_output: (B, L_enc, d_model)."""
    w32, w2, bias = packed_params
    B, Lq, D = dec_input.shape
    Be, Lk, De = enc_output.shape
    assert D == D_MODEL and De == D_MODEL and Be == B
    if b_tile is None:
        b_tile = _choose_b_tile(B, Lq, Lk)
    assert B % b_tile == 0
    assert b_tile == B or ((b_tile * Lq) % 16 == 0 and (b_tile * Lk) % 16 == 0)
    rows_q = b_tile * Lq
    rows_k = b_tile * Lk

    # Flatten (batch, seq) -> rows in the wrapper (layout plumbing) and store the
    # activation I/O in bf16: halves HBM DMA bytes and the narrow-lane writeback.
    dec2 = dec_input.reshape(B * Lq, D).astype(io_dtype)
    enc2 = enc_output.reshape(B * Lk, D).astype(io_dtype)

    kernel = functools.partial(decoder_layer_kernel, b_tile=b_tile,
                               len_dec=Lq, len_enc=Lk, approx_recip=approx_recip)

    out2 = pl.pallas_call(
        kernel,
        out_shape=jax.ShapeDtypeStruct((B * Lq, D), io_dtype),
        grid=(B // b_tile,),
        in_specs=[pl.BlockSpec((rows_q, D), lambda i: (i, 0)),
                  pl.BlockSpec((rows_k, D), lambda i: (i, 0)),
                  pl.BlockSpec(w32.shape, lambda i: (0, 0)),
                  pl.BlockSpec(w2.shape, lambda i: (0, 0)),
                  pl.BlockSpec(bias.shape, lambda i: (0, 0))],
        out_specs=pl.BlockSpec((rows_q, D), lambda i: (i, 0)),
        compiler_params=pltpu.CompilerParams(
            dimension_semantics=("parallel",),
            vmem_limit_bytes=48 * 1024 * 1024),
    )(dec2, enc2, w32, w2, bias)
    # Return in the caller's dtype (PyTorch module contract: f32 in -> f32 out).
    return out2.reshape(B, Lq, D).astype(dec_input.dtype)


# ---- deterministic parameter init (synthetic weights, PyTorch-equivalent layout) --
def init_params(key):
    keys = iter(jax.random.split(key, 32))

    def lin(fan_in, fan_out):
        w = jax.random.normal(next(keys), (fan_in, fan_out), jnp.float32) / math.sqrt(fan_in)
        b = 0.01 * jax.random.normal(next(keys), (1, fan_out), jnp.float32)
        return w, b

    def attn_block():
        wq, bq = lin(D_MODEL, N_HEAD * D_K)
        wk, bk = lin(D_MODEL, N_HEAD * D_K)
        wv, bv = lin(D_MODEL, N_HEAD * D_V)
        wo, bo = lin(N_HEAD * D_V, D_MODEL)
        return dict(wq=wq, bq=bq, wk=wk, bk=bk, wv=wv, bv=bv, wo=wo, bo=bo,
                    gamma=jnp.ones((1, D_MODEL), jnp.float32),
                    beta=jnp.zeros((1, D_MODEL), jnp.float32))

    slf = attn_block()
    enc = attn_block()
    w1, b1 = lin(D_MODEL, D_INNER)
    w2, b2 = lin(D_INNER, D_MODEL)
    ffn = dict(w1=w1, b1=b1, w2=w2, b2=b2,
               gamma=jnp.ones((1, D_MODEL), jnp.float32),
               beta=jnp.zeros((1, D_MODEL), jnp.float32))
    return dict(slf=slf, enc=enc, ffn=ffn)


def pack_params(p):
    """One-time packing: fold 1/sqrt(d_k) into the Q projections and lay everything
    out as three DMA-friendly slabs with 128-lane-aligned weight slots."""
    scale = 1.0 / math.sqrt(D_K)
    slf, enc, ffn = p["slf"], p["enc"], p["ffn"]

    w32 = jnp.zeros((D_MODEL, _N_WSLOTS * _SLOT), jnp.float32)

    def put_w(slab, slot, w):
        return slab.at[:, slot * _SLOT: slot * _SLOT + w.shape[1]].set(w)

    w32 = put_w(w32, _S_WQ1, slf["wq"] * scale)
    w32 = put_w(w32, _S_WK1, slf["wk"])
    w32 = put_w(w32, _S_WV1, slf["wv"])
    w32 = put_w(w32, _S_WO1, slf["wo"])
    w32 = put_w(w32, _S_WQ2, enc["wq"] * scale)
    w32 = put_w(w32, _S_WK2, enc["wk"])
    w32 = put_w(w32, _S_WV2, enc["wv"])
    w32 = put_w(w32, _S_WO2, enc["wo"])
    w32 = put_w(w32, _S_W1, ffn["w1"])

    bias = jnp.zeros((_N_BROWS, _SLOT), jnp.float32)

    def put_b(slab, row, v):
        return slab.at[row:row + 1, 0:v.shape[1]].set(v)

    bias = put_b(bias, _R_BQ1, slf["bq"] * scale)
    bias = put_b(bias, _R_BK1, slf["bk"])
    bias = put_b(bias, _R_BV1, slf["bv"])
    bias = put_b(bias, _R_BO1, slf["bo"])
    bias = put_b(bias, _R_G1, slf["gamma"])
    bias = put_b(bias, _R_BE1, slf["beta"])
    bias = put_b(bias, _R_BQ2, enc["bq"] * scale)
    bias = put_b(bias, _R_BK2, enc["bk"])
    bias = put_b(bias, _R_BV2, enc["bv"])
    bias = put_b(bias, _R_BO2, enc["bo"])
    bias = put_b(bias, _R_G2, enc["gamma"])
    bias = put_b(bias, _R_BE2, enc["beta"])
    bias = put_b(bias, _R_BFF1, ffn["b1"])
    bias = put_b(bias, _R_BFF2, ffn["b2"])
    bias = put_b(bias, _R_G3, ffn["gamma"])
    bias = put_b(bias, _R_BE3, ffn["beta"])

    return (w32, ffn["w2"], bias)


if __name__ == "__main__":
    key = jax.random.PRNGKey(0)
    k_dec, k_enc, k_par = jax.random.split(key, 3)

    B, L = 2, 8
    dec_input = jax.random.normal(k_dec, (B, L, D_MODEL), jnp.float32)
    enc_output = jax.random.normal(k_enc, (B, L, D_MODEL), jnp.float32)
    packed = pack_params(init_params(k_par))

    out = decoder_layer(dec_input, enc_output, packed)
    out = jax.block_until_ready(out)

    assert out.shape == (B, L, D_MODEL)
    assert bool(jnp.all(jnp.isfinite(out)))
    print("KERNEL_OK")
</pallas_src>

<mosaic_0001>
module attributes {stable_mosaic.version = 11 : i64} {
  func.func @decoder_layer_kernel(%arg0: i32, %arg1: memref<16x32xbf16, #tpu.memory_space<vmem>>, %arg2: memref<16x32xbf16, #tpu.memory_space<vmem>>, %arg3: memref<32x1152xf32, #tpu.memory_space<vmem>>, %arg4: memref<64x32xf32, #tpu.memory_space<vmem>>, %arg5: memref<16x128xf32, #tpu.memory_space<vmem>>, %arg6: memref<16x32xbf16, #tpu.memory_space<vmem>>) attributes {dimension_semantics = [#tpu.dimension_semantics<parallel>], iteration_bounds = array<i64: 1>, scalar_prefetch = 0 : i64, scratch_operands = 0 : i64, tpu.core_type = #tpu.core_type<tc>, window_params = [{transform_indices = @transform_0, window_bounds = array<i64: 16, 32>}, {transform_indices = @transform_1, window_bounds = array<i64: 16, 32>}, {pipeline_mode = #tpu.pipeline_mode<synchronous>, transform_indices = @transform_2, window_bounds = array<i64: 32, 1152>}, {pipeline_mode = #tpu.pipeline_mode<synchronous>, transform_indices = @transform_3, window_bounds = array<i64: 64, 32>}, {pipeline_mode = #tpu.pipeline_mode<synchronous>, transform_indices = @transform_4, window_bounds = array<i64: 16, 128>}, {transform_indices = @transform_5, window_bounds = array<i64: 16, 32>}]} {
    %c0 = arith.constant 0 : index
    %c0_0 = arith.constant 0 : index
    %0 = vector.load %arg3[%c0, %c0_0] : memref<32x1152xf32, #tpu.memory_space<vmem>>, vector<32x1152xf32>
    %c0_1 = arith.constant 0 : index
    %c0_2 = arith.constant 0 : index
    %1 = vector.load %arg5[%c0_1, %c0_2] : memref<16x128xf32, #tpu.memory_space<vmem>>, vector<16x128xf32>
    %c0_3 = arith.constant 0 : index
    %c0_4 = arith.constant 0 : index
    %2 = vector.load %arg1[%c0_3, %c0_4] : memref<16x32xbf16, #tpu.memory_space<vmem>>, vector<16x32xbf16>
    %3 = arith.extf %2 : vector<16x32xbf16> to vector<16x32xf32>
    %c0_5 = arith.constant 0 : index
    %c0_6 = arith.constant 0 : index
    %4 = vector.load %arg2[%c0_5, %c0_6] : memref<16x32xbf16, #tpu.memory_space<vmem>>, vector<16x32xbf16>
    %5 = arith.extf %4 : vector<16x32xbf16> to vector<16x32xf32>
    %6 = vector.extract_strided_slice %0 {offsets = [0, 0], sizes = [32, 32], strides = [1, 1]} : vector<32x1152xf32> to vector<32x32xf32>
    %7 = vector.extract_strided_slice %0 {offsets = [0, 128], sizes = [32, 32], strides = [1, 1]} : vector<32x1152xf32> to vector<32x32xf32>
    %8 = vector.extract_strided_slice %0 {offsets = [0, 256], sizes = [32, 32], strides = [1, 1]} : vector<32x1152xf32> to vector<32x32xf32>
    %9 = vector.extract_strided_slice %0 {offsets = [0, 384], sizes = [32, 32], strides = [1, 1]} : vector<32x1152xf32> to vector<32x32xf32>
    %10 = vector.extract_strided_slice %1 {offsets = [0, 0], sizes = [1, 32], strides = [1, 1]} : vector<16x128xf32> to vector<1x32xf32>
    %11 = vector.extract_strided_slice %1 {offsets = [1, 0], sizes = [1, 32], strides = [1, 1]} : vector<16x128xf32> to vector<1x32xf32>
    %12 = vector.extract_strided_slice %1 {offsets = [2, 0], sizes = [1, 32], strides = [1, 1]} : vector<16x128xf32> to vector<1x32xf32>
    %cst = arith.constant 0.000000e+00 : f32
    %13 = vector.broadcast %cst : f32 to vector<16x32xf32>
    %14 = vector.extract_strided_slice %6 {offsets = [0, 0], sizes = [32, 8], strides = [1, 1]} : vector<32x32xf32> to vector<32x8xf32>
    %cst_7 = arith.constant dense<0.000000e+00> : vector<16x8xf32>
    %15 = tpu.matmul %3, %14, %cst_7 {dimension_numbers = #tpu.dot_dimension_numbers<[1], [0], [0], [1], [0, 0, 1, 1], [], []>} : vector<16x32xf32>, vector<32x8xf32>, vector<16x8xf32> -> vector<16x8xf32>
    %16 = vector.extract_strided_slice %10 {offsets = [0, 0], sizes = [1, 8], strides = [1, 1]} : vector<1x32xf32> to vector<1x8xf32>
    %17 = vector.broadcast %16 : vector<1x8xf32> to vector<16x8xf32>
    %18 = arith.addf %15, %17 : vector<16x8xf32>
    %19 = vector.shape_cast %18 : vector<16x8xf32> to vector<2x8x8xf32>
    %20 = vector.extract_strided_slice %7 {offsets = [0, 0], sizes = [32, 8], strides = [1, 1]} : vector<32x32xf32> to vector<32x8xf32>
    %cst_8 = arith.constant dense<0.000000e+00> : vector<16x8xf32>
    %21 = tpu.matmul %3, %20, %cst_8 {dimension_numbers = #tpu.dot_dimension_numbers<[1], [0], [0], [1], [0, 0, 1, 1], [], []>} : vector<16x32xf32>, vector<32x8xf32>, vector<16x8xf32> -> vector<16x8xf32>
    %22 = vector.extract_strided_slice %11 {offsets = [0, 0], sizes = [1, 8], strides = [1, 1]} : vector<1x32xf32> to vector<1x8xf32>
    %23 = vector.broadcast %22 : vector<1x8xf32> to vector<16x8xf32>
    %24 = arith.addf %21, %23 : vector<16x8xf32>
    %25 = vector.shape_cast %24 : vector<16x8xf32> to vector<2x8x8xf32>
    %26 = vector.extract_strided_slice %8 {offsets = [0, 0], sizes = [32, 8], strides = [1, 1]} : vector<32x32xf32> to vector<32x8xf32>
    %cst_9 = arith.constant dense<0.000000e+00> : vector<16x8xf32>
    %27 = tpu.matmul %3, %26, %cst_9 {dimension_numbers = #tpu.dot_dimension_numbers<[1], [0], [0], [1], [0, 0, 1, 1], [], []>} : vector<16x32xf32>, vector<32x8xf32>, vector<16x8xf32> -> vector<16x8xf32>
    %28 = vector.extract_strided_slice %12 {offsets = [0, 0], sizes = [1, 8], strides = [1, 1]} : vector<1x32xf32> to vector<1x8xf32>
    %29 = vector.broadcast %28 : vector<1x8xf32> to vector<16x8xf32>
    %30 = arith.addf %27, %29 : vector<16x8xf32>
    %31 = vector.shape_cast %30 : vector<16x8xf32> to vector<2x8x8xf32>
    "tpu.trace_start"() <{level = 10 : i32, message = "bqd,bkd->bqk"}> : () -> ()
    %cst_10 = arith.constant dense<0.000000e+00> : vector<2x8x8xf32>
    %32 = tpu.matmul %19, %25, %cst_10 {dimension_numbers = #tpu.dot_dimension_numbers<[2], [2], [1], [1], [0, 0, 0, 1, 1, 1], [0], [0]>} : vector<2x8x8xf32>, vector<2x8x8xf32>, vector<2x8x8xf32> -> vector<2x8x8xf32>
    "tpu.trace_stop"() : () -> ()
    %cst_11 = arith.constant dense<0xFF800000> : vector<2x8xf32>
    %33 = vector.multi_reduction <maximumf>, %32, %cst_11 [2] : vector<2x8x8xf32> to vector<2x8xf32>
    %34 = vector.shape_cast %33 : vector<2x8xf32> to vector<2x8x1xf32>
    %35 = vector.broadcast %34 : vector<2x8x1xf32> to vector<2x8x8xf32>
    %36 = arith.subf %32, %35 : vector<2x8x8xf32>
    %37 = math.exp %36 : vector<2x8x8xf32>
    %cst_12 = arith.constant dense<0.000000e+00> : vector<2x8xf32>
    %38 = vector.multi_reduction <add>, %37, %cst_12 [2] : vector<2x8x8xf32> to vector<2x8xf32>
    %39 = vector.shape_cast %38 : vector<2x8xf32> to vector<2x8x1xf32>
    %40 = tpu.reciprocal %39 {approx = true} : vector<2x8x1xf32> -> vector<2x8x1xf32>
    %41 = vector.broadcast %40 : vector<2x8x1xf32> to vector<2x8x8xf32>
    %42 = arith.mulf %37, %41 : vector<2x8x8xf32>
    "tpu.trace_start"() <{level = 10 : i32, message = "bqk,bkd->bqd"}> : () -> ()
    %cst_13 = arith.constant dense<0.000000e+00> : vector<2x8x8xf32>
    %43 = tpu.matmul %42, %31, %cst_13 {dimension_numbers = #tpu.dot_dimension_numbers<[2], [1], [1], [2], [0, 0, 0, 1, 1, 2], [0], [0]>} : vector<2x8x8xf32>, vector<2x8x8xf32>, vector<2x8x8xf32> -> vector<2x8x8xf32>
    "tpu.trace_stop"() : () -> ()
    %44 = vector.shape_cast %43 : vector<2x8x8xf32> to vector<16x8xf32>
    %45 = vector.extract_strided_slice %9 {offsets = [0, 0], sizes = [8, 32], strides = [1, 1]} : vector<32x32xf32> to vector<8x32xf32>
    %cst_14 = arith.constant dense<0.000000e+00> : vector<16x32xf32>
    %46 = tpu.matmul %44, %45, %cst_14 {dimension_numbers = #tpu.dot_dimension_numbers<[1], [0], [0], [1], [0, 0, 1, 1], [], []>} : vector<16x8xf32>, vector<8x32xf32>, vector<16x32xf32> -> vector<16x32xf32>
    %47 = arith.addf %13, %46 : vector<16x32xf32>
    %48 = vector.extract_strided_slice %6 {offsets = [0, 8], sizes = [32, 8], strides = [1, 1]} : vector<32x32xf32> to vector<32x8xf32>
    %cst_15 = arith.constant dense<0.000000e+00> : vector<16x8xf32>
    %49 = tpu.matmul %3, %48, %cst_15 {dimension_numbers = #tpu.dot_dimension_numbers<[1], [0], [0], [1], [0, 0, 1, 1], [], []>} : vector<16x32xf32>, vector<32x8xf32>, vector<16x8xf32> -> vector<16x8xf32>
    %50 = vector.extract_strided_slice %10 {offsets = [0, 8], sizes = [1, 8], strides = [1, 1]} : vector<1x32xf32> to vector<1x8xf32>
    %51 = vector.broadcast %50 : vector<1x8xf32> to vector<16x8xf32>
    %52 = arith.addf %49, %51 : vector<16x8xf32>
    %53 = vector.shape_cast %52 : vector<16x8xf32> to vector<2x8x8xf32>
    %54 = vector.extract_strided_slice %7 {offsets = [0, 8], sizes = [32, 8], strides = [1, 1]} : vector<32x32xf32> to vector<32x8xf32>
    %cst_16 = arith.constant dense<0.000000e+00> : vector<16x8xf32>
    %55 = tpu.matmul %3, %54, %cst_16 {dimension_numbers = #tpu.dot_dimension_numbers<[1], [0], [0], [1], [0, 0, 1, 1], [], []>} : vector<16x32xf32>, vector<32x8xf32>, vector<16x8xf32> -> vector<16x8xf32>
    %56 = vector.extract_strided_slice %11 {offsets = [0, 8], sizes = [1, 8], strides = [1, 1]} : vector<1x32xf32> to vector<1x8xf32>
    %57 = vector.broadcast %56 : vector<1x8xf32> to vector<16x8xf32>
    %58 = arith.addf %55, %57 : vector<16x8xf32>
    %59 = vector.shape_cast %58 : vector<16x8xf32> to vector<2x8x8xf32>
    %60 = vector.extract_strided_slice %8 {offsets = [0, 8], sizes = [32, 8], strides = [1, 1]} : vector<32x32xf32> to vector<32x8xf32>
    %cst_17 = arith.constant dense<0.000000e+00> : vector<16x8xf32>
    %61 = tpu.matmul %3, %60, %cst_17 {dimension_numbers = #tpu.dot_dimension_numbers<[1], [0], [0], [1], [0, 0, 1, 1], [], []>} : vector<16x32xf32>, vector<32x8xf32>, vector<16x8xf32> -> vector<16x8xf32>
    %62 = vector.extract_strided_slice %12 {offsets = [0, 8], sizes = [1, 8], strides = [1, 1]} : vector<1x32xf32> to vector<1x8xf32>
    %63 = vector.broadcast %62 : vector<1x8xf32> to vector<16x8xf32>
    %64 = arith.addf %61, %63 : vector<16x8xf32>
    %65 = vector.shape_cast %64 : vector<16x8xf32> to vector<2x8x8xf32>
    "tpu.trace_start"() <{level = 10 : i32, message = "bqd,bkd->bqk"}> : () -> ()
    %cst_18 = arith.constant dense<0.000000e+00> : vector<2x8x8xf32>
    %66 = tpu.matmul %53, %59, %cst_18 {dimension_numbers = #tpu.dot_dimension_numbers<[2], [2], [1], [1], [0, 0, 0, 1, 1, 1], [0], [0]>} : vector<2x8x8xf32>, vector<2x8x8xf32>, vector<2x8x8xf32> -> vector<2x8x8xf32>
    "tpu.trace_stop"() : () -> ()
    %cst_19 = arith.constant dense<0xFF800000> : vector<2x8xf32>
    %67 = vector.multi_reduction <maximumf>, %66, %cst_19 [2] : vector<2x8x8xf32> to vector<2x8xf32>
    %68 = vector.shape_cast %67 : vector<2x8xf32> to vector<2x8x1xf32>
    %69 = vector.broadcast %68 : vector<2x8x1xf32> to vector<2x8x8xf32>
    %70 = arith.subf %66, %69 : vector<2x8x8xf32>
    %71 = math.exp %70 : vector<2x8x8xf32>
    %cst_20 = arith.constant dense<0.000000e+00> : vector<2x8xf32>
    %72 = vector.multi_reduction <add>, %71, %cst_20 [2] : vector<2x8x8xf32> to vector<2x8xf32>
    %73 = vector.shape_cast %72 : vector<2x8xf32> to vector<2x8x1xf32>
    %74 = tpu.reciprocal %73 {approx = true} : vector<2x8x1xf32> -> vector<2x8x1xf32>
    %75 = vector.broadcast %74 : vector<2x8x1xf32> to vector<2x8x8xf32>
    %76 = arith.mulf %71, %75 : vector<2x8x8xf32>
    "tpu.trace_start"() <{level = 10 : i32, message = "bqk,bkd->bqd"}> : () -> ()
    %cst_21 = arith.constant dense<0.000000e+00> : vector<2x8x8xf32>
    %77 = tpu.matmul %76, %65, %cst_21 {dimension_numbers = #tpu.dot_dimension_numbers<[2], [1], [1], [2], [0, 0, 0, 1, 1, 2], [0], [0]>} : vector<2x8x8xf32>, vector<2x8x8xf32>, vector<2x8x8xf32> -> vector<2x8x8xf32>
    "tpu.trace_stop"() : () -> ()
    %78 = vector.shape_cast %77 : vector<2x8x8xf32> to vector<16x8xf32>
    %79 = vector.extract_strided_slice %9 {offsets = [8, 0], sizes = [8, 32], strides = [1, 1]} : vector<32x32xf32> to vector<8x32xf32>
    %cst_22 = arith.constant dense<0.000000e+00> : vector<16x32xf32>
    %80 = tpu.matmul %78, %79, %cst_22 {dimension_numbers = #tpu.dot_dimension_numbers<[1], [0], [0], [1], [0, 0, 1, 1], [], []>} : vector<16x8xf32>, vector<8x32xf32>, vector<16x32xf32> -> vector<16x32xf32>
    %81 = arith.addf %47, %80 : vector<16x32xf32>
    %82 = vector.extract_strided_slice %6 {offsets = [0, 16], sizes = [32, 8], strides = [1, 1]} : vector<32x32xf32> to vector<32x8xf32>
    %cst_23 = arith.constant dense<0.000000e+00> : vector<16x8xf32>
    %83 = tpu.matmul %3, %82, %cst_23 {dimension_numbers = #tpu.dot_dimension_numbers<[1], [0], [0], [1], [0, 0, 1, 1], [], []>} : vector<16x32xf32>, vector<32x8xf32>, vector<16x8xf32> -> vector<16x8xf32>
    %84 = vector.extract_strided_slice %10 {offsets = [0, 16], sizes = [1, 8], strides = [1, 1]} : vector<1x32xf32> to vector<1x8xf32>
    %85 = vector.broadcast %84 : vector<1x8xf32> to vector<16x8xf32>
    %86 = arith.addf %83, %85 : vector<16x8xf32>
    %87 = vector.shape_cast %86 : vector<16x8xf32> to vector<2x8x8xf32>
    %88 = vector.extract_strided_slice %7 {offsets = [0, 16], sizes = [32, 8], strides = [1, 1]} : vector<32x32xf32> to vector<32x8xf32>
    %cst_24 = arith.constant dense<0.000000e+00> : vector<16x8xf32>
    %89 = tpu.matmul %3, %88, %cst_24 {dimension_numbers = #tpu.dot_dimension_numbers<[1], [0], [0], [1], [0, 0, 1, 1], [], []>} : vector<16x32xf32>, vector<32x8xf32>, vector<16x8xf32> -> vector<16x8xf32>
    %90 = vector.extract_strided_slice %11 {offsets = [0, 16], sizes = [1, 8], strides = [1, 1]} : vector<1x32xf32> to vector<1x8xf32>
    %91 = vector.broadcast %90 : vector<1x8xf32> to vector<16x8xf32>
    %92 = arith.addf %89, %91 : vector<16x8xf32>
    %93 = vector.shape_cast %92 : vector<16x8xf32> to vector<2x8x8xf32>
    %94 = vector.extract_strided_slice %8 {offsets = [0, 16], sizes = [32, 8], strides = [1, 1]} : vector<32x32xf32> to vector<32x8xf32>
    %cst_25 = arith.constant dense<0.000000e+00> : vector<16x8xf32>
    %95 = tpu.matmul %3, %94, %cst_25 {dimension_numbers = #tpu.dot_dimension_numbers<[1], [0], [0], [1], [0, 0, 1, 1], [], []>} : vector<16x32xf32>, vector<32x8xf32>, vector<16x8xf32> -> vector<16x8xf32>
    %96 = vector.extract_strided_slice %12 {offsets = [0, 16], sizes = [1, 8], strides = [1, 1]} : vector<1x32xf32> to vector<1x8xf32>
    %97 = vector.broadcast %96 : vector<1x8xf32> to vector<16x8xf32>
    %98 = arith.addf %95, %97 : vector<16x8xf32>
    %99 = vector.shape_cast %98 : vector<16x8xf32> to vector<2x8x8xf32>
    "tpu.trace_start"() <{level = 10 : i32, message = "bqd,bkd->bqk"}> : () -> ()
    %cst_26 = arith.constant dense<0.000000e+00> : vector<2x8x8xf32>
    %100 = tpu.matmul %87, %93, %cst_26 {dimension_numbers = #tpu.dot_dimension_numbers<[2], [2], [1], [1], [0, 0, 0, 1, 1, 1], [0], [0]>} : vector<2x8x8xf32>, vector<2x8x8xf32>, vector<2x8x8xf32> -> vector<2x8x8xf32>
    "tpu.trace_stop"() : () -> ()
    %cst_27 = arith.constant dense<0xFF800000> : vector<2x8xf32>
    %101 = vector.multi_reduction <maximumf>, %100, %cst_27 [2] : vector<2x8x8xf32> to vector<2x8xf32>
    %102 = vector.shape_cast %101 : vector<2x8xf32> to vector<2x8x1xf32>
    %103 = vector.broadcast %102 : vector<2x8x1xf32> to vector<2x8x8xf32>
    %104 = arith.subf %100, %103 : vector<2x8x8xf32>
    %105 = math.exp %104 : vector<2x8x8xf32>
    %cst_28 = arith.constant dense<0.000000e+00> : vector<2x8xf32>
    %106 = vector.multi_reduction <add>, %105, %cst_28 [2] : vector<2x8x8xf32> to vector<2x8xf32>
    %107 = vector.shape_cast %106 : vector<2x8xf32> to vector<2x8x1xf32>
    %108 = tpu.reciprocal %107 {approx = true} : vector<2x8x1xf32> -> vector<2x8x1xf32>
    %109 = vector.broadcast %108 : vector<2x8x1xf32> to vector<2x8x8xf32>
    %110 = arith.mulf %105, %109 : vector<2x8x8xf32>
    "tpu.trace_start"() <{level = 10 : i32, message = "bqk,bkd->bqd"}> : () -> ()
    %cst_29 = arith.constant dense<0.000000e+00> : vector<2x8x8xf32>
    %111 = tpu.matmul %110, %99, %cst_29 {dimension_numbers = #tpu.dot_dimension_numbers<[2], [1], [1], [2], [0, 0, 0, 1, 1, 2], [0], [0]>} : vector<2x8x8xf32>, vector<2x8x8xf32>, vector<2x8x8xf32> -> vector<2x8x8xf32>
    "tpu.trace_stop"() : () -> ()
    %112 = vector.shape_cast %111 : vector<2x8x8xf32> to vector<16x8xf32>
    %113 = vector.extract_strided_slice %9 {offsets = [16, 0], sizes = [8, 32], strides = [1, 1]} : vector<32x32xf32> to vector<8x32xf32>
    %cst_30 = arith.constant dense<0.000000e+00> : vector<16x32xf32>
    %114 = tpu.matmul %112, %113, %cst_30 {dimension_numbers = #tpu.dot_dimension_numbers<[1], [0], [0], [1], [0, 0, 1, 1], [], []>} : vector<16x8xf32>, vector<8x32xf32>, vector<16x32xf32> -> vector<16x32xf32>
    %115 = arith.addf %81, %114 : vector<16x32xf32>
    %116 = vector.extract_strided_slice %6 {offsets = [0, 24], sizes = [32, 8], strides = [1, 1]} : vector<32x32xf32> to vector<32x8xf32>
    %cst_31 = arith.constant dense<0.000000e+00> : vector<16x8xf32>
    %117 = tpu.matmul %3, %116, %cst_31 {dimension_numbers = #tpu.dot_dimension_numbers<[1], [0], [0], [1], [0, 0, 1, 1], [], []>} : vector<16x32xf32>, vector<32x8xf32>, vector<16x8xf32> -> vector<16x8xf32>
    %118 = vector.extract_strided_slice %10 {offsets = [0, 24], sizes = [1, 8], strides = [1, 1]} : vector<1x32xf32> to vector<1x8xf32>
    %119 = vector.broadcast %118 : vector<1x8xf32> to vector<16x8xf32>
    %120 = arith.addf %117, %119 : vector<16x8xf32>
    %121 = vector.shape_cast %120 : vector<16x8xf32> to vector<2x8x8xf32>
    %122 = vector.extract_strided_slice %7 {offsets = [0, 24], sizes = [32, 8], strides = [1, 1]} : vector<32x32xf32> to vector<32x8xf32>
    %cst_32 = arith.constant dense<0.000000e+00> : vector<16x8xf32>
    %123 = tpu.matmul %3, %122, %cst_32 {dimension_numbers = #tpu.dot_dimension_numbers<[1], [0], [0], [1], [0, 0, 1, 1], [], []>} : vector<16x32xf32>, vector<32x8xf32>, vector<16x8xf32> -> vector<16x8xf32>
    %124 = vector.extract_strided_slice %11 {offsets = [0, 24], sizes = [1, 8], strides = [1, 1]} : vector<1x32xf32> to vector<1x8xf32>
    %125 = vector.broadcast %124 : vector<1x8xf32> to vector<16x8xf32>
    %126 = arith.addf %123, %125 : vector<16x8xf32>
    %127 = vector.shape_cast %126 : vector<16x8xf32> to vector<2x8x8xf32>
    %128 = vector.extract_strided_slice %8 {offsets = [0, 24], sizes = [32, 8], strides = [1, 1]} : vector<32x32xf32> to vector<32x8xf32>
    %cst_33 = arith.constant dense<0.000000e+00> : vector<16x8xf32>
    %129 = tpu.matmul %3, %128, %cst_33 {dimension_numbers = #tpu.dot_dimension_numbers<[1], [0], [0], [1], [0, 0, 1, 1], [], []>} : vector<16x32xf32>, vector<32x8xf32>, vector<16x8xf32> -> vector<16x8xf32>
    %130 = vector.extract_strided_slice %12 {offsets = [0, 24], sizes = [1, 8], strides = [1, 1]} : vector<1x32xf32> to vector<1x8xf32>
    %131 = vector.broadcast %130 : vector<1x8xf32> to vector<16x8xf32>
    %132 = arith.addf %129, %131 : vector<16x8xf32>
    %133 = vector.shape_cast %132 : vector<16x8xf32> to vector<2x8x8xf32>
    "tpu.trace_start"() <{level = 10 : i32, message = "bqd,bkd->bqk"}> : () -> ()
    %cst_34 = arith.constant dense<0.000000e+00> : vector<2x8x8xf32>
    %134 = tpu.matmul %121, %127, %cst_34 {dimension_numbers = #tpu.dot_dimension_numbers<[2], [2], [1], [1], [0, 0, 0, 1, 1, 1], [0], [0]>} : vector<2x8x8xf32>, vector<2x8x8xf32>, vector<2x8x8xf32> -> vector<2x8x8xf32>
    "tpu.trace_stop"() : () -> ()
    %cst_35 = arith.constant dense<0xFF800000> : vector<2x8xf32>
    %135 = vector.multi_reduction <maximumf>, %134, %cst_35 [2] : vector<2x8x8xf32> to vector<2x8xf32>
    %136 = vector.shape_cast %135 : vector<2x8xf32> to vector<2x8x1xf32>
    %137 = vector.broadcast %136 : vector<2x8x1xf32> to vector<2x8x8xf32>
    %138 = arith.subf %134, %137 : vector<2x8x8xf32>
    %139 = math.exp %138 : vector<2x8x8xf32>
    %cst_36 = arith.constant dense<0.000000e+00> : vector<2x8xf32>
    %140 = vector.multi_reduction <add>, %139, %cst_36 [2] : vector<2x8x8xf32> to vector<2x8xf32>
    %141 = vector.shape_cast %140 : vector<2x8xf32> to vector<2x8x1xf32>
    %142 = tpu.reciprocal %141 {approx = true} : vector<2x8x1xf32> -> vector<2x8x1xf32>
    %143 = vector.broadcast %142 : vector<2x8x1xf32> to vector<2x8x8xf32>
    %144 = arith.mulf %139, %143 : vector<2x8x8xf32>
    "tpu.trace_start"() <{level = 10 : i32, message = "bqk,bkd->bqd"}> : () -> ()
    %cst_37 = arith.constant dense<0.000000e+00> : vector<2x8x8xf32>
    %145 = tpu.matmul %144, %133, %cst_37 {dimension_numbers = #tpu.dot_dimension_numbers<[2], [1], [1], [2], [0, 0, 0, 1, 1, 2], [0], [0]>} : vector<2x8x8xf32>, vector<2x8x8xf32>, vector<2x8x8xf32> -> vector<2x8x8xf32>
    "tpu.trace_stop"() : () -> ()
    %146 = vector.shape_cast %145 : vector<2x8x8xf32> to vector<16x8xf32>
    %147 = vector.extract_strided_slice %9 {offsets = [24, 0], sizes = [8, 32], strides = [1, 1]} : vector<32x32xf32> to vector<8x32xf32>
    %cst_38 = arith.constant dense<0.000000e+00> : vector<16x32xf32>
    %148 = tpu.matmul %146, %147, %cst_38 {dimension_numbers = #tpu.dot_dimension_numbers<[1], [0], [0], [1], [0, 0, 1, 1], [], []>} : vector<16x8xf32>, vector<8x32xf32>, vector<16x32xf32> -> vector<16x32xf32>
    %149 = arith.addf %115, %148 : vector<16x32xf32>
    %150 = vector.extract_strided_slice %1 {offsets = [3, 0], sizes = [1, 32], strides = [1, 1]} : vector<16x128xf32> to vector<1x32xf32>
    %151 = vector.broadcast %150 : vector<1x32xf32> to vector<16x32xf32>
    %152 = arith.addf %149, %151 : vector<16x32xf32>
    %153 = arith.addf %152, %3 : vector<16x32xf32>
    %154 = vector.extract_strided_slice %1 {offsets = [4, 0], sizes = [1, 32], strides = [1, 1]} : vector<16x128xf32> to vector<1x32xf32>
    %155 = vector.extract_strided_slice %1 {offsets = [5, 0], sizes = [1, 32], strides = [1, 1]} : vector<16x128xf32> to vector<1x32xf32>
    %cst_39 = arith.constant dense<0.000000e+00> : vector<16xf32>
    %156 = vector.multi_reduction <add>, %153, %cst_39 [1] : vector<16x32xf32> to vector<16xf32>
    %157 = vector.shape_cast %156 : vector<16xf32> to vector<16x1xf32>
    %cst_40 = arith.constant 3.125000e-02 : f32
    %158 = vector.broadcast %cst_40 : f32 to vector<16x1xf32>
    %159 = arith.mulf %157, %158 : vector<16x1xf32>
    %160 = arith.mulf %153, %153 : vector<16x32xf32>
    %cst_41 = arith.constant dense<0.000000e+00> : vector<16xf32>
    %161 = vector.multi_reduction <add>, %160, %cst_41 [1] : vector<16x32xf32> to vector<16xf32>
    %162 = vector.shape_cast %161 : vector<16xf32> to vector<16x1xf32>
    %cst_42 = arith.constant 3.125000e-02 : f32
    %163 = vector.broadcast %cst_42 : f32 to vector<16x1xf32>
    %164 = arith.mulf %162, %163 : vector<16x1xf32>
    %165 = arith.mulf %159, %159 : vector<16x1xf32>
    %166 = arith.subf %164, %165 : vector<16x1xf32>
    %cst_43 = arith.constant 0.000000e+00 : f32
    %167 = vector.broadcast %cst_43 : f32 to vector<16x1xf32>
    %168 = arith.maximumf %166, %167 : vector<16x1xf32>
    %169 = vector.broadcast %159 : vector<16x1xf32> to vector<16x32xf32>
    %170 = arith.subf %153, %169 : vector<16x32xf32>
    %cst_44 = arith.constant 9.99999997E-7 : f32
    %171 = vector.broadcast %cst_44 : f32 to vector<16x1xf32>
    %172 = arith.addf %168, %171 : vector<16x1xf32>
    %173 = math.rsqrt %172 : vector<16x1xf32>
    %174 = vector.broadcast %173 : vector<16x1xf32> to vector<16x32xf32>
    %175 = arith.mulf %170, %174 : vector<16x32xf32>
    %176 = vector.broadcast %154 : vector<1x32xf32> to vector<16x32xf32>
    %177 = arith.mulf %175, %176 : vector<16x32xf32>
    %178 = vector.broadcast %155 : vector<1x32xf32> to vector<16x32xf32>
    %179 = arith.addf %177, %178 : vector<16x32xf32>
    %180 = vector.extract_strided_slice %0 {offsets = [0, 512], sizes = [32, 32], strides = [1, 1]} : vector<32x1152xf32> to vector<32x32xf32>
    %181 = vector.extract_strided_slice %0 {offsets = [0, 640], sizes = [32, 32], strides = [1, 1]} : vector<32x1152xf32> to vector<32x32xf32>
    %182 = vector.extract_strided_slice %0 {offsets = [0, 768], sizes = [32, 32], strides = [1, 1]} : vector<32x1152xf32> to vector<32x32xf32>
    %183 = vector.extract_strided_slice %0 {offsets = [0, 896], sizes = [32, 32], strides = [1, 1]} : vector<32x1152xf32> to vector<32x32xf32>
    %184 = vector.extract_strided_slice %1 {offsets = [6, 0], sizes = [1, 32], strides = [1, 1]} : vector<16x128xf32> to vector<1x32xf32>
    %185 = vector.extract_strided_slice %1 {offsets = [7, 0], sizes = [1, 32], strides = [1, 1]} : vector<16x128xf32> to vector<1x32xf32>
    %186 = vector.extract_strided_slice %1 {offsets = [8, 0], sizes = [1, 32], strides = [1, 1]} : vector<16x128xf32> to vector<1x32xf32>
    %cst_45 = arith.constant 0.000000e+00 : f32
    %187 = vector.broadcast %cst_45 : f32 to vector<16x32xf32>
    %188 = vector.extract_strided_slice %180 {offsets = [0, 0], sizes = [32, 8], strides = [1, 1]} : vector<32x32xf32> to vector<32x8xf32>
    %cst_46 = arith.constant dense<0.000000e+00> : vector<16x8xf32>
    %189 = tpu.matmul %179, %188, %cst_46 {dimension_numbers = #tpu.dot_dimension_numbers<[1], [0], [0], [1], [0, 0, 1, 1], [], []>} : vector<16x32xf32>, vector<32x8xf32>, vector<16x8xf32> -> vector<16x8xf32>
    %190 = vector.extract_strided_slice %184 {offsets = [0, 0], sizes = [1, 8], strides = [1, 1]} : vector<1x32xf32> to vector<1x8xf32>
    %191 = vector.broadcast %190 : vector<1x8xf32> to vector<16x8xf32>
    %192 = arith.addf %189, %191 : vector<16x8xf32>
    %193 = vector.shape_cast %192 : vector<16x8xf32> to vector<2x8x8xf32>
    %194 = vector.extract_strided_slice %181 {offsets = [0, 0], sizes = [32, 8], strides = [1, 1]} : vector<32x32xf32> to vector<32x8xf32>
    %cst_47 = arith.constant dense<0.000000e+00> : vector<16x8xf32>
    %195 = tpu.matmul %5, %194, %cst_47 {dimension_numbers = #tpu.dot_dimension_numbers<[1], [0], [0], [1], [0, 0, 1, 1], [], []>} : vector<16x32xf32>, vector<32x8xf32>, vector<16x8xf32> -> vector<16x8xf32>
    %196 = vector.extract_strided_slice %185 {offsets = [0, 0], sizes = [1, 8], strides = [1, 1]} : vector<1x32xf32> to vector<1x8xf32>
    %197 = vector.broadcast %196 : vector<1x8xf32> to vector<16x8xf32>
    %198 = arith.addf %195, %197 : vector<16x8xf32>
    %199 = vector.shape_cast %198 : vector<16x8xf32> to vector<2x8x8xf32>
    %200 = vector.extract_strided_slice %182 {offsets = [0, 0], sizes = [32, 8], strides = [1, 1]} : vector<32x32xf32> to vector<32x8xf32>
    %cst_48 = arith.constant dense<0.000000e+00> : vector<16x8xf32>
    %201 = tpu.matmul %5, %200, %cst_48 {dimension_numbers = #tpu.dot_dimension_numbers<[1], [0], [0], [1], [0, 0, 1, 1], [], []>} : vector<16x32xf32>, vector<32x8xf32>, vector<16x8xf32> -> vector<16x8xf32>
    %202 = vector.extract_strided_slice %186 {offsets = [0, 0], sizes = [1, 8], strides = [1, 1]} : vector<1x32xf32> to vector<1x8xf32>
    %203 = vector.broadcast %202 : vector<1x8xf32> to vector<16x8xf32>
    %204 = arith.addf %201, %203 : vector<16x8xf32>
    %205 = vector.shape_cast %204 : vector<16x8xf32> to vector<2x8x8xf32>
    "tpu.trace_start"() <{level = 10 : i32, message = "bqd,bkd->bqk"}> : () -> ()
    %cst_49 = arith.constant dense<0.000000e+00> : vector<2x8x8xf32>
    %206 = tpu.matmul %193, %199, %cst_49 {dimension_numbers = #tpu.dot_dimension_numbers<[2], [2], [1], [1], [0, 0, 0, 1, 1, 1], [0], [0]>} : vector<2x8x8xf32>, vector<2x8x8xf32>, vector<2x8x8xf32> -> vector<2x8x8xf32>
    "tpu.trace_stop"() : () -> ()
    %cst_50 = arith.constant dense<0xFF800000> : vector<2x8xf32>
    %207 = vector.multi_reduction <maximumf>, %206, %cst_50 [2] : vector<2x8x8xf32> to vector<2x8xf32>
    %208 = vector.shape_cast %207 : vector<2x8xf32> to vector<2x8x1xf32>
    %209 = vector.broadcast %208 : vector<2x8x1xf32> to vector<2x8x8xf32>
    %210 = arith.subf %206, %209 : vector<2x8x8xf32>
    %211 = math.exp %210 : vector<2x8x8xf32>
    %cst_51 = arith.constant dense<0.000000e+00> : vector<2x8xf32>
    %212 = vector.multi_reduction <add>, %211, %cst_51 [2] : vector<2x8x8xf32> to vector<2x8xf32>
    %213 = vector.shape_cast %212 : vector<2x8xf32> to vector<2x8x1xf32>
    %214 = tpu.reciprocal %213 {approx = true} : vector<2x8x1xf32> -> vector<2x8x1xf32>
    %215 = vector.broadcast %214 : vector<2x8x1xf32> to vector<2x8x8xf32>
    %216 = arith.mulf %211, %215 : vector<2x8x8xf32>
    "tpu.trace_start"() <{level = 10 : i32, message = "bqk,bkd->bqd"}> : () -> ()
    %cst_52 = arith.constant dense<0.000000e+00> : vector<2x8x8xf32>
    %217 = tpu.matmul %216, %205, %cst_52 {dimension_numbers = #tpu.dot_dimension_numbers<[2], [1], [1], [2], [0, 0, 0, 1, 1, 2], [0], [0]>} : vector<2x8x8xf32>, vector<2x8x8xf32>, vector<2x8x8xf32> -> vector<2x8x8xf32>
    "tpu.trace_stop"() : () -> ()
    %218 = vector.shape_cast %217 : vector<2x8x8xf32> to vector<16x8xf32>
    %219 = vector.extract_strided_slice %183 {offsets = [0, 0], sizes = [8, 32], strides = [1, 1]} : vector<32x32xf32> to vector<8x32xf32>
    %cst_53 = arith.constant dense<0.000000e+00> : vector<16x32xf32>
    %220 = tpu.matmul %218, %219, %cst_53 {dimension_numbers = #tpu.dot_dimension_numbers<[1], [0], [0], [1], [0, 0, 1, 1], [], []>} : vector<16x8xf32>, vector<8x32xf32>, vector<16x32xf32> -> vector<16x32xf32>
    %221 = arith.addf %187, %220 : vector<16x32xf32>
    %222 = vector.extract_strided_slice %180 {offsets = [0, 8], sizes = [32, 8], strides = [1, 1]} : vector<32x32xf32> to vector<32x8xf32>
    %cst_54 = arith.constant dense<0.000000e+00> : vector<16x8xf32>
    %223 = tpu.matmul %179, %222, %cst_54 {dimension_numbers = #tpu.dot_dimension_numbers<[1], [0], [0], [1], [0, 0, 1, 1], [], []>} : vector<16x32xf32>, vector<32x8xf32>, vector<16x8xf32> -> vector<16x8xf32>
    %224 = vector.extract_strided_slice %184 {offsets = [0, 8], sizes = [1, 8], strides = [1, 1]} : vector<1x32xf32> to vector<1x8xf32>
    %225 = vector.broadcast %224 : vector<1x8xf32> to vector<16x8xf32>
    %226 = arith.addf %223, %225 : vector<16x8xf32>
    %227 = vector.shape_cast %226 : vector<16x8xf32> to vector<2x8x8xf32>
    %228 = vector.extract_strided_slice %181 {offsets = [0, 8], sizes = [32, 8], strides = [1, 1]} : vector<32x32xf32> to vector<32x8xf32>
    %cst_55 = arith.constant dense<0.000000e+00> : vector<16x8xf32>
    %229 = tpu.matmul %5, %228, %cst_55 {dimension_numbers = #tpu.dot_dimension_numbers<[1], [0], [0], [1], [0, 0, 1, 1], [], []>} : vector<16x32xf32>, vector<32x8xf32>, vector<16x8xf32> -> vector<16x8xf32>
    %230 = vector.extract_strided_slice %185 {offsets = [0, 8], sizes = [1, 8], strides = [1, 1]} : vector<1x32xf32> to vector<1x8xf32>
    %231 = vector.broadcast %230 : vector<1x8xf32> to vector<16x8xf32>
    %232 = arith.addf %229, %231 : vector<16x8xf32>
    %233 = vector.shape_cast %232 : vector<16x8xf32> to vector<2x8x8xf32>
    %234 = vector.extract_strided_slice %182 {offsets = [0, 8], sizes = [32, 8], strides = [1, 1]} : vector<32x32xf32> to vector<32x8xf32>
    %cst_56 = arith.constant dense<0.000000e+00> : vector<16x8xf32>
    %235 = tpu.matmul %5, %234, %cst_56 {dimension_numbers = #tpu.dot_dimension_numbers<[1], [0], [0], [1], [0, 0, 1, 1], [], []>} : vector<16x32xf32>, vector<32x8xf32>, vector<16x8xf32> -> vector<16x8xf32>
    %236 = vector.extract_strided_slice %186 {offsets = [0, 8], sizes = [1, 8], strides = [1, 1]} : vector<1x32xf32> to vector<1x8xf32>
    %237 = vector.broadcast %236 : vector<1x8xf32> to vector<16x8xf32>
    %238 = arith.addf %235, %237 : vector<16x8xf32>
    %239 = vector.shape_cast %238 : vector<16x8xf32> to vector<2x8x8xf32>
    "tpu.trace_start"() <{level = 10 : i32, message = "bqd,bkd->bqk"}> : () -> ()
    %cst_57 = arith.constant dense<0.000000e+00> : vector<2x8x8xf32>
    %240 = tpu.matmul %227, %233, %cst_57 {dimension_numbers = #tpu.dot_dimension_numbers<[2], [2], [1], [1], [0, 0, 0, 1, 1, 1], [0], [0]>} : vector<2x8x8xf32>, vector<2x8x8xf32>, vector<2x8x8xf32> -> vector<2x8x8xf32>
    "tpu.trace_stop"() : () -> ()
    %cst_58 = arith.constant dense<0xFF800000> : vector<2x8xf32>
    %241 = vector.multi_reduction <maximumf>, %240, %cst_58 [2] : vector<2x8x8xf32> to vector<2x8xf32>
    %242 = vector.shape_cast %241 : vector<2x8xf32> to vector<2x8x1xf32>
    %243 = vector.broadcast %242 : vector<2x8x1xf32> to vector<2x8x8xf32>
    %244 = arith.subf %240, %243 : vector<2x8x8xf32>
    %245 = math.exp %244 : vector<2x8x8xf32>
    %cst_59 = arith.constant dense<0.000000e+00> : vector<2x8xf32>
    %246 = vector.multi_reduction <add>, %245, %cst_59 [2] : vector<2x8x8xf32> to vector<2x8xf32>
    %247 = vector.shape_cast %246 : vector<2x8xf32> to vector<2x8x1xf32>
    %248 = tpu.reciprocal %247 {approx = true} : vector<2x8x1xf32> -> vector<2x8x1xf32>
    %249 = vector.broadcast %248 : vector<2x8x1xf32> to vector<2x8x8xf32>
    %250 = arith.mulf %245, %249 : vector<2x8x8xf32>
    "tpu.trace_start"() <{level = 10 : i32, message = "bqk,bkd->bqd"}> : () -> ()
    %cst_60 = arith.constant dense<0.000000e+00> : vector<2x8x8xf32>
    %251 = tpu.matmul %250, %239, %cst_60 {dimension_numbers = #tpu.dot_dimension_numbers<[2], [1], [1], [2], [0, 0, 0, 1, 1, 2], [0], [0]>} : vector<2x8x8xf32>, vector<2x8x8xf32>, vector<2x8x8xf32> -> vector<2x8x8xf32>
    "tpu.trace_stop"() : () -> ()
    %252 = vector.shape_cast %251 : vector<2x8x8xf32> to vector<16x8xf32>
    %253 = vector.extract_strided_slice %183 {offsets = [8, 0], sizes = [8, 32], strides = [1, 1]} : vector<32x32xf32> to vector<8x32xf32>
    %cst_61 = arith.constant dense<0.000000e+00> : vector<16x32xf32>
    %254 = tpu.matmul %252, %253, %cst_61 {dimension_numbers = #tpu.dot_dimension_numbers<[1], [0], [0], [1], [0, 0, 1, 1], [], []>} : vector<16x8xf32>, vector<8x32xf32>, vector<16x32xf32> -> vector<16x32xf32>
    %255 = arith.addf %221, %254 : vector<16x32xf32>
    %256 = vector.extract_strided_slice %180 {offsets = [0, 16], sizes = [32, 8], strides = [1, 1]} : vector<32x32xf32> to vector<32x8xf32>
    %cst_62 = arith.constant dense<0.000000e+00> : vector<16x8xf32>
    %257 = tpu.matmul %179, %256, %cst_62 {dimension_numbers = #tpu.dot_dimension_numbers<[1], [0], [0], [1], [0, 0, 1, 1], [], []>} : vector<16x32xf32>, vector<32x8xf32>, vector<16x8xf32> -> vector<16x8xf32>
    %258 = vector.extract_strided_slice %184 {offsets = [0, 16], sizes = [1, 8], strides = [1, 1]} : vector<1x32xf32> to vector<1x8xf32>
    %259 = vector.broadcast %258 : vector<1x8xf32> to vector<16x8xf32>
    %260 = arith.addf %257, %259 : vector<16x8xf32>
    %261 = vector.shape_cast %260 : vector<16x8xf32> to vector<2x8x8xf32>
    %262 = vector.extract_strided_slice %181 {offsets = [0, 16], sizes = [32, 8], strides = [1, 1]} : vector<32x32xf32> to vector<32x8xf32>
    %cst_63 = arith.constant dense<0.000000e+00> : vector<16x8xf32>
    %263 = tpu.matmul %5, %262, %cst_63 {dimension_numbers = #tpu.dot_dimension_numbers<[1], [0], [0], [1], [0, 0, 1, 1], [], []>} : vector<16x32xf32>, vector<32x8xf32>, vector<16x8xf32> -> vector<16x8xf32>
    %264 = vector.extract_strided_slice %185 {offsets = [0, 16], sizes = [1, 8], strides = [1, 1]} : vector<1x32xf32> to vector<1x8xf32>
    %265 = vector.broadcast %264 : vector<1x8xf32> to vector<16x8xf32>
    %266 = arith.addf %263, %265 : vector<16x8xf32>
    %267 = vector.shape_cast %266 : vector<16x8xf32> to vector<2x8x8xf32>
    %268 = vector.extract_strided_slice %182 {offsets = [0, 16], sizes = [32, 8], strides = [1, 1]} : vector<32x32xf32> to vector<32x8xf32>
    %cst_64 = arith.constant dense<0.000000e+00> : vector<16x8xf32>
    %269 = tpu.matmul %5, %268, %cst_64 {dimension_numbers = #tpu.dot_dimension_numbers<[1], [0], [0], [1], [0, 0, 1, 1], [], []>} : vector<16x32xf32>, vector<32x8xf32>, vector<16x8xf32> -> vector<16x8xf32>
    %270 = vector.extract_strided_slice %186 {offsets = [0, 16], sizes = [1, 8], strides = [1, 1]} : vector<1x32xf32> to vector<1x8xf32>
    %271 = vector.broadcast %270 : vector<1x8xf32> to vector<16x8xf32>
    %272 = arith.addf %269, %271 : vector<16x8xf32>
    %273 = vector.shape_cast %272 : vector<16x8xf32> to vector<2x8x8xf32>
    "tpu.trace_start"() <{level = 10 : i32, message = "bqd,bkd->bqk"}> : () -> ()
    %cst_65 = arith.constant dense<0.000000e+00> : vector<2x8x8xf32>
    %274 = tpu.matmul %261, %267, %cst_65 {dimension_numbers = #tpu.dot_dimension_numbers<[2], [2], [1], [1], [0, 0, 0, 1, 1, 1], [0], [0]>} : vector<2x8x8xf32>, vector<2x8x8xf32>, vector<2x8x8xf32> -> vector<2x8x8xf32>
    "tpu.trace_stop"() : () -> ()
    %cst_66 = arith.constant dense<0xFF800000> : vector<2x8xf32>
    %275 = vector.multi_reduction <maximumf>, %274, %cst_66 [2] : vector<2x8x8xf32> to vector<2x8xf32>
    %276 = vector.shape_cast %275 : vector<2x8xf32> to vector<2x8x1xf32>
    %277 = vector.broadcast %276 : vector<2x8x1xf32> to vector<2x8x8xf32>
    %278 = arith.subf %274, %277 : vector<2x8x8xf32>
    %279 = math.exp %278 : vector<2x8x8xf32>
    %cst_67 = arith.constant dense<0.000000e+00> : vector<2x8xf32>
    %280 = vector.multi_reduction <add>, %279, %cst_67 [2] : vector<2x8x8xf32> to vector<2x8xf32>
    %281 = vector.shape_cast %280 : vector<2x8xf32> to vector<2x8x1xf32>
    %282 = tpu.reciprocal %281 {approx = true} : vector<2x8x1xf32> -> vector<2x8x1xf32>
    %283 = vector.broadcast %282 : vector<2x8x1xf32> to vector<2x8x8xf32>
    %284 = arith.mulf %279, %283 : vector<2x8x8xf32>
    "tpu.trace_start"() <{level = 10 : i32, message = "bqk,bkd->bqd"}> : () -> ()
    %cst_68 = arith.constant dense<0.000000e+00> : vector<2x8x8xf32>
    %285 = tpu.matmul %284, %273, %cst_68 {dimension_numbers = #tpu.dot_dimension_numbers<[2], [1], [1], [2], [0, 0, 0, 1, 1, 2], [0], [0]>} : vector<2x8x8xf32>, vector<2x8x8xf32>, vector<2x8x8xf32> -> vector<2x8x8xf32>
    "tpu.trace_stop"() : () -> ()
    %286 = vector.shape_cast %285 : vector<2x8x8xf32> to vector<16x8xf32>
    %287 = vector.extract_strided_slice %183 {offsets = [16, 0], sizes = [8, 32], strides = [1, 1]} : vector<32x32xf32> to vector<8x32xf32>
    %cst_69 = arith.constant dense<0.000000e+00> : vector<16x32xf32>
    %288 = tpu.matmul %286, %287, %cst_69 {dimension_numbers = #tpu.dot_dimension_numbers<[1], [0], [0], [1], [0, 0, 1, 1], [], []>} : vector<16x8xf32>, vector<8x32xf32>, vector<16x32xf32> -> vector<16x32xf32>
    %289 = arith.addf %255, %288 : vector<16x32xf32>
    %290 = vector.extract_strided_slice %180 {offsets = [0, 24], sizes = [32, 8], strides = [1, 1]} : vector<32x32xf32> to vector<32x8xf32>
    %cst_70 = arith.constant dense<0.000000e+00> : vector<16x8xf32>
    %291 = tpu.matmul %179, %290, %cst_70 {dimension_numbers = #tpu.dot_dimension_numbers<[1], [0], [0], [1], [0, 0, 1, 1], [], []>} : vector<16x32xf32>, vector<32x8xf32>, vector<16x8xf32> -> vector<16x8xf32>
    %292 = vector.extract_strided_slice %184 {offsets = [0, 24], sizes = [1, 8], strides = [1, 1]} : vector<1x32xf32> to vector<1x8xf32>
    %293 = vector.broadcast %292 : vector<1x8xf32> to vector<16x8xf32>
    %294 = arith.addf %291, %293 : vector<16x8xf32>
    %295 = vector.shape_cast %294 : vector<16x8xf32> to vector<2x8x8xf32>
    %296 = vector.extract_strided_slice %181 {offsets = [0, 24], sizes = [32, 8], strides = [1, 1]} : vector<32x32xf32> to vector<32x8xf32>
    %cst_71 = arith.constant dense<0.000000e+00> : vector<16x8xf32>
    %297 = tpu.matmul %5, %296, %cst_71 {dimension_numbers = #tpu.dot_dimension_numbers<[1], [0], [0], [1], [0, 0, 1, 1], [], []>} : vector<16x32xf32>, vector<32x8xf32>, vector<16x8xf32> -> vector<16x8xf32>
    %298 = vector.extract_strided_slice %185 {offsets = [0, 24], sizes = [1, 8], strides = [1, 1]} : vector<1x32xf32> to vector<1x8xf32>
    %299 = vector.broadcast %298 : vector<1x8xf32> to vector<16x8xf32>
    %300 = arith.addf %297, %299 : vector<16x8xf32>
    %301 = vector.shape_cast %300 : vector<16x8xf32> to vector<2x8x8xf32>
    %302 = vector.extract_strided_slice %182 {offsets = [0, 24], sizes = [32, 8], strides = [1, 1]} : vector<32x32xf32> to vector<32x8xf32>
    %cst_72 = arith.constant dense<0.000000e+00> : vector<16x8xf32>
    %303 = tpu.matmul %5, %302, %cst_72 {dimension_numbers = #tpu.dot_dimension_numbers<[1], [0], [0], [1], [0, 0, 1, 1], [], []>} : vector<16x32xf32>, vector<32x8xf32>, vector<16x8xf32> -> vector<16x8xf32>
    %304 = vector.extract_strided_slice %186 {offsets = [0, 24], sizes = [1, 8], strides = [1, 1]} : vector<1x32xf32> to vector<1x8xf32>
    %305 = vector.broadcast %304 : vector<1x8xf32> to vector<16x8xf32>
    %306 = arith.addf %303, %305 : vector<16x8xf32>
    %307 = vector.shape_cast %306 : vector<16x8xf32> to vector<2x8x8xf32>
    "tpu.trace_start"() <{level = 10 : i32, message = "bqd,bkd->bqk"}> : () -> ()
    %cst_73 = arith.constant dense<0.000000e+00> : vector<2x8x8xf32>
    %308 = tpu.matmul %295, %301, %cst_73 {dimension_numbers = #tpu.dot_dimension_numbers<[2], [2], [1], [1], [0, 0, 0, 1, 1, 1], [0], [0]>} : vector<2x8x8xf32>, vector<2x8x8xf32>, vector<2x8x8xf32> -> vector<2x8x8xf32>
    "tpu.trace_stop"() : () -> ()
    %cst_74 = arith.constant dense<0xFF800000> : vector<2x8xf32>
    %309 = vector.multi_reduction <maximumf>, %308, %cst_74 [2] : vector<2x8x8xf32> to vector<2x8xf32>
    %310 = vector.shape_cast %309 : vector<2x8xf32> to vector<2x8x1xf32>
    %311 = vector.broadcast %310 : vector<2x8x1xf32> to vector<2x8x8xf32>
    %312 = arith.subf %308, %311 : vector<2x8x8xf32>
    %313 = math.exp %312 : vector<2x8x8xf32>
    %cst_75 = arith.constant dense<0.000000e+00> : vector<2x8xf32>
    %314 = vector.multi_reduction <add>, %313, %cst_75 [2] : vector<2x8x8xf32> to vector<2x8xf32>
    %315 = vector.shape_cast %314 : vector<2x8xf32> to vector<2x8x1xf32>
    %316 = tpu.reciprocal %315 {approx = true} : vector<2x8x1xf32> -> vector<2x8x1xf32>
    %317 = vector.broadcast %316 : vector<2x8x1xf32> to vector<2x8x8xf32>
    %318 = arith.mulf %313, %317 : vector<2x8x8xf32>
    "tpu.trace_start"() <{level = 10 : i32, message = "bqk,bkd->bqd"}> : () -> ()
    %cst_76 = arith.constant dense<0.000000e+00> : vector<2x8x8xf32>
    %319 = tpu.matmul %318, %307, %cst_76 {dimension_numbers = #tpu.dot_dimension_numbers<[2], [1], [1], [2], [0, 0, 0, 1, 1, 2], [0], [0]>} : vector<2x8x8xf32>, vector<2x8x8xf32>, vector<2x8x8xf32> -> vector<2x8x8xf32>
    "tpu.trace_stop"() : () -> ()
    %320 = vector.shape_cast %319 : vector<2x8x8xf32> to vector<16x8xf32>
    %321 = vector.extract_strided_slice %183 {offsets = [24, 0], sizes = [8, 32], strides = [1, 1]} : vector<32x32xf32> to vector<8x32xf32>
    %cst_77 = arith.constant dense<0.000000e+00> : vector<16x32xf32>
    %322 = tpu.matmul %320, %321, %cst_77 {dimension_numbers = #tpu.dot_dimension_numbers<[1], [0], [0], [1], [0, 0, 1, 1], [], []>} : vector<16x8xf32>, vector<8x32xf32>, vector<16x32xf32> -> vector<16x32xf32>
    %323 = arith.addf %289, %322 : vector<16x32xf32>
    %324 = vector.extract_strided_slice %1 {offsets = [9, 0], sizes = [1, 32], strides = [1, 1]} : vector<16x128xf32> to vector<1x32xf32>
    %325 = vector.broadcast %324 : vector<1x32xf32> to vector<16x32xf32>
    %326 = arith.addf %323, %325 : vector<16x32xf32>
    %327 = arith.addf %326, %179 : vector<16x32xf32>
    %328 = vector.extract_strided_slice %1 {offsets = [10, 0], sizes = [1, 32], strides = [1, 1]} : vector<16x128xf32> to vector<1x32xf32>
    %329 = vector.extract_strided_slice %1 {offsets = [11, 0], sizes = [1, 32], strides = [1, 1]} : vector<16x128xf32> to vector<1x32xf32>
    %cst_78 = arith.constant dense<0.000000e+00> : vector<16xf32>
    %330 = vector.multi_reduction <add>, %327, %cst_78 [1] : vector<16x32xf32> to vector<16xf32>
    %331 = vector.shape_cast %330 : vector<16xf32> to vector<16x1xf32>
    %cst_79 = arith.constant 3.125000e-02 : f32
    %332 = vector.broadcast %cst_79 : f32 to vector<16x1xf32>
    %333 = arith.mulf %331, %332 : vector<16x1xf32>
    %334 = arith.mulf %327, %327 : vector<16x32xf32>
    %cst_80 = arith.constant dense<0.000000e+00> : vector<16xf32>
    %335 = vector.multi_reduction <add>, %334, %cst_80 [1] : vector<16x32xf32> to vector<16xf32>
    %336 = vector.shape_cast %335 : vector<16xf32> to vector<16x1xf32>
    %cst_81 = arith.constant 3.125000e-02 : f32
    %337 = vector.broadcast %cst_81 : f32 to vector<16x1xf32>
    %338 = arith.mulf %336, %337 : vector<16x1xf32>
    %339 = arith.mulf %333, %333 : vector<16x1xf32>
    %340 = arith.subf %338, %339 : vector<16x1xf32>
    %cst_82 = arith.constant 0.000000e+00 : f32
    %341 = vector.broadcast %cst_82 : f32 to vector<16x1xf32>
    %342 = arith.maximumf %340, %341 : vector<16x1xf32>
    %343 = vector.broadcast %333 : vector<16x1xf32> to vector<16x32xf32>
    %344 = arith.subf %327, %343 : vector<16x32xf32>
    %cst_83 = arith.constant 9.99999997E-7 : f32
    %345 = vector.broadcast %cst_83 : f32 to vector<16x1xf32>
    %346 = arith.addf %342, %345 : vector<16x1xf32>
    %347 = math.rsqrt %346 : vector<16x1xf32>
    %348 = vector.broadcast %347 : vector<16x1xf32> to vector<16x32xf32>
    %349 = arith.mulf %344, %348 : vector<16x32xf32>
    %350 = vector.broadcast %328 : vector<1x32xf32> to vector<16x32xf32>
    %351 = arith.mulf %349, %350 : vector<16x32xf32>
    %352 = vector.broadcast %329 : vector<1x32xf32> to vector<16x32xf32>
    %353 = arith.addf %351, %352 : vector<16x32xf32>
    %354 = vector.extract_strided_slice %0 {offsets = [0, 1024], sizes = [32, 64], strides = [1, 1]} : vector<32x1152xf32> to vector<32x64xf32>
    %cst_84 = arith.constant dense<0.000000e+00> : vector<16x64xf32>
    %355 = tpu.matmul %353, %354, %cst_84 {dimension_numbers = #tpu.dot_dimension_numbers<[1], [0], [0], [1], [0, 0, 1, 1], [], []>} : vector<16x32xf32>, vector<32x64xf32>, vector<16x64xf32> -> vector<16x64xf32>
    %356 = vector.extract_strided_slice %1 {offsets = [12, 0], sizes = [1, 64], strides = [1, 1]} : vector<16x128xf32> to vector<1x64xf32>
    %357 = vector.broadcast %356 : vector<1x64xf32> to vector<16x64xf32>
    %358 = arith.addf %355, %357 : vector<16x64xf32>
    %cst_85 = arith.constant 0.000000e+00 : f32
    %359 = vector.broadcast %cst_85 : f32 to vector<16x64xf32>
    %360 = arith.maximumf %358, %359 : vector<16x64xf32>
    %c0_86 = arith.constant 0 : index
    %c0_87 = arith.constant 0 : index
    %361 = vector.load %arg4[%c0_86, %c0_87] : memref<64x32xf32, #tpu.memory_space<vmem>>, vector<64x32xf32>
    %cst_88 = arith.constant dense<0.000000e+00> : vector<16x32xf32>
    %362 = tpu.matmul %360, %361, %cst_88 {dimension_numbers = #tpu.dot_dimension_numbers<[1], [0], [0], [1], [0, 0, 1, 1], [], []>} : vector<16x64xf32>, vector<64x32xf32>, vector<16x32xf32> -> vector<16x32xf32>
    %363 = vector.extract_strided_slice %1 {offsets = [13, 0], sizes = [1, 32], strides = [1, 1]} : vector<16x128xf32> to vector<1x32xf32>
    %364 = vector.broadcast %363 : vector<1x32xf32> to vector<16x32xf32>
    %365 = arith.addf %362, %364 : vector<16x32xf32>
    %366 = arith.addf %365, %353 : vector<16x32xf32>
    %367 = vector.extract_strided_slice %1 {offsets = [14, 0], sizes = [1, 32], strides = [1, 1]} : vector<16x128xf32> to vector<1x32xf32>
    %368 = vector.extract_strided_slice %1 {offsets = [15, 0], sizes = [1, 32], strides = [1, 1]} : vector<16x128xf32> to vector<1x32xf32>
    %cst_89 = arith.constant dense<0.000000e+00> : vector<16xf32>
    %369 = vector.multi_reduction <add>, %366, %cst_89 [1] : vector<16x32xf32> to vector<16xf32>
    %370 = vector.shape_cast %369 : vector<16xf32> to vector<16x1xf32>
    %cst_90 = arith.constant 3.125000e-02 : f32
    %371 = vector.broadcast %cst_90 : f32 to vector<16x1xf32>
    %372 = arith.mulf %370, %371 : vector<16x1xf32>
    %373 = arith.mulf %366, %366 : vector<16x32xf32>
    %cst_91 = arith.constant dense<0.000000e+00> : vector<16xf32>
    %374 = vector.multi_reduction <add>, %373, %cst_91 [1] : vector<16x32xf32> to vector<16xf32>
    %375 = vector.shape_cast %374 : vector<16xf32> to vector<16x1xf32>
    %cst_92 = arith.constant 3.125000e-02 : f32
    %376 = vector.broadcast %cst_92 : f32 to vector<16x1xf32>
    %377 = arith.mulf %375, %376 : vector<16x1xf32>
    %378 = arith.mulf %372, %372 : vector<16x1xf32>
    %379 = arith.subf %377, %378 : vector<16x1xf32>
    %cst_93 = arith.constant 0.000000e+00 : f32
    %380 = vector.broadcast %cst_93 : f32 to vector<16x1xf32>
    %381 = arith.maximumf %379, %380 : vector<16x1xf32>
    %382 = vector.broadcast %372 : vector<16x1xf32> to vector<16x32xf32>
    %383 = arith.subf %366, %382 : vector<16x32xf32>
    %cst_94 = arith.constant 9.99999997E-7 : f32
    %384 = vector.broadcast %cst_94 : f32 to vector<16x1xf32>
    %385 = arith.addf %381, %384 : vector<16x1xf32>
    %386 = math.rsqrt %385 : vector<16x1xf32>
    %387 = vector.broadcast %386 : vector<16x1xf32> to vector<16x32xf32>
    %388 = arith.mulf %383, %387 : vector<16x32xf32>
    %389 = vector.broadcast %367 : vector<1x32xf32> to vector<16x32xf32>
    %390 = arith.mulf %388, %389 : vector<16x32xf32>
    %391 = vector.broadcast %368 : vector<1x32xf32> to vector<16x32xf32>
    %392 = arith.addf %390, %391 : vector<16x32xf32>
    %393 = arith.truncf %392 : vector<16x32xf32> to vector<16x32xbf16>
    %c0_95 = arith.constant 0 : index
    %c0_96 = arith.constant 0 : index
    %394 = vector.load %arg6[%c0_95, %c0_96] : memref<16x32xbf16, #tpu.memory_space<vmem>>, vector<16x32xbf16>
    tpu.vector_store %arg6[%c0_95, %c0_96], %393 {strides = array<i32>} : memref<16x32xbf16, #tpu.memory_space<vmem>>, vector<16x32xbf16>,
    return
  }
  func.func @transform_0(%arg0: i32) -> (i32, i32) {
    %c0_i32 = arith.constant 0 : i32
    %c0_i32_0 = arith.constant 0 : i32
    return %arg0, %c0_i32 : i32, i32
  }
  func.func @transform_1(%arg0: i32) -> (i32, i32) {
    %c0_i32 = arith.constant 0 : i32
    %c0_i32_0 = arith.constant 0 : i32
    return %arg0, %c0_i32 : i32, i32
  }
  func.func @transform_2(%arg0: i32) -> (i32, i32) {
    %c0_i32 = arith.constant 0 : i32
    %c0_i32_0 = arith.constant 0 : i32
    %c0_i32_1 = arith.constant 0 : i32
    return %c0_i32, %c0_i32_0 : i32, i32
  }
  func.func @transform_3(%arg0: i32) -> (i32, i32) {
    %c0_i32 = arith.constant 0 : i32
    %c0_i32_0 = arith.constant 0 : i32
    %c0_i32_1 = arith.constant 0 : i32
    return %c0_i32, %c0_i32_0 : i32, i32
  }
  func.func @transform_4(%arg0: i32) -> (i32, i32) {
    %c0_i32 = arith.constant 0 : i32
    %c0_i32_0 = arith.constant 0 : i32
    %c0_i32_1 = arith.constant 0 : i32
    return %c0_i32, %c0_i32_0 : i32, i32
  }
  func.func @transform_5(%arg0: i32) -> (i32, i32) {
    %c0_i32 = arith.constant 0 : i32
    %c0_i32_0 = arith.constant 0 : i32
    return %arg0, %c0_i32 : i32, i32
  }
}

</mosaic_0001>

<bundles_post_ra>
// kernel: tpu_custom_call.1
= control target key start
LH: loop header
LB: loop body
LE: loop exit
PB: predicated region body
PF: predicated region fallthrough
CT: control target
= control target key end

     0   :  { %10 = vsyncpa [#allocation3], 0  ;;  %s7630_s0 = inlined_call_operand.vmem [shape: bf16[16,32], index: 0, kind: input, shape index: {}]   ;;  %s7631_s1 = inlined_call_operand.vmem [shape: bf16[16,32], index: 1, kind: input, shape index: {}]   ;;  %s7632_s2 = inlined_call_operand.hbm [shape: f32[32,1152], index: 2, kind: input, shape index: {}]   ;;  %s7633_s3 = inlined_call_operand.vmem [shape: f32[64,32], index: 3, kind: input, shape index: {}]   ;;  %s7634_s4 = inlined_call_operand.vmem [shape: f32[16,128], index: 4, kind: input, shape index: {}]   ;;  %s7635_s5 = inlined_call_operand.hbm [shape: bf16[16,32], index: 5, kind: output, shape index: {}]  }
   0x1   :  { %11 = vsyncpa [#allocation4], 0  ;;  %s6803_s18 = smov [#allocation2]  }
   0x2   :  { %s21_s19 = sshll.u32 %s6803_s18, 4  ;;  %s22_s19 = int_to_ptr.vmem [resolvable:$true] %s21_s19 }
   0x3   :  { %s6767_s20 = scalar_lea.vmem %s22_s19, 4608  ;;  %p6772_p1 = scmp.lt.s32.totalorder %s22_s19, %s22_s19 }
   0x4   :  { %p6768_p0 = scmp.ne.s32.totalorder %s22_s19, %s6767_s20  ;;  %p6773_p2 = scmp.lt.s32.totalorder %s6767_s20, %s6767_s20 }
   0x6   :  { %p6774_p3 = por %p6773_p2, %p6772_p1 }
   0x8   :  { %p6775_p4 = pnand %p6774_p3, %p6768_p0 }
   0xa   :  { %6778 = shalt.err (!%p6775_p4)
}
   0xb   :  { %s6804_s21 = smov 1152   ;;  %s6805_s22 = smov 72  }
   0xc   :  { %27 = dma.hbm_to_vmem [thread:$0]  %s7632_s2, 4608, %s22_s19, [#allocation3], %s6804_s21, %s6804_s21, %s6805_s22  }
   0xd   :  { %6799 = dma.done.wait [#allocation3], 4608  }
   0xe   :  { %6800 = vsyncadd [#allocation3], 4294962688  ;;  %v6847_v0 = vld [vmem:[#allocation2 + $0xe0] sm:$0xff]  ;;  %v6849_v1 = vld [vmem:[#allocation2 + $0xd8] sm:$0xff]  ;;  %vm85_vm0 = vcmask 261120   ;;  %v6806_v15 = vmov 0.0   ;;  %v81_v16 = vlaneseq }
   0xf   :  { %v6851_v2 = vld [vmem:[#allocation2 + $0x98] sm:$0xff]  ;;  %6187 = vmatprep.subr.mxu1 %v6847_v0  ;;  %6176 = vmatprep.subr.mxu0 %v6849_v1  ;;  %v6855_v3 = vld [vmem:[#allocation2 + $0x90] sm:$0xff]  ;;  %v6861_v5 = vld [vmem:[#allocation2 + $0x48] sm:$0xff]  ;;  %vm6807_vm1 = vmmov 0   ;;  %vm325_vm2 = vcmask 64512   ;;  %s6808_s27 = smov 120  }
  0x10   :  { %6188 = vmatpush3.msra.mxu1 %v6847_v0  ;;  %6177 = vmatpush3.msra.mxu0 %v6849_v1  ;;  %v6859_v4 = vld [vmem:[#allocation2 + $0x50] sm:$0xff]  ;;  %v5921_v6 = vld [vmem:[%s7630_s0] sm:$0xff]   ;;  %v6870_v7 = vld [vmem:[#allocation2 + $0x8] sm:$0xff]  ;;  %v6920_v17 = vshrl.u32 %v81_v16, 7  ;;  %s6809_s28 = smov 112   ;;  %s6810_s29 = smov 104  }
  0x11   :  { %6189 = vmatprep.subr.mxu1 %v6851_v2  ;;  %6178 = vmatprep.subr.mxu0 %v6855_v3  ;;  %v6872_v8 = vld [vmem:[#allocation2] sm:$0xff]  ;;  %v6874_v9 = vunpack.c.l.bf16 %v5921_v6  ;;  %v6880_v10 = vunpack.c.h.bf16 %v5921_v6  ;;  %v6887_v11 = vld [vmem:[#allocation2 + $0xe8] sm:$0xff]  ;;  %v6904_v13 = vld [vmem:[#allocation2 + $0x58] sm:$0xff]  ;;  %vm5644_vm3 = vcmask 523264   ;;  %vm5780_vm4 = vcmask 257024  }
  0x12   :  { %6190 = vmatpush3.msra.mxu1 %v6851_v2  ;;  %6179 = vmatpush3.msra.mxu0 %v6855_v3  ;;  %v6896_v12 = vld [vmem:[#allocation2 + $0xa0] sm:$0xff]  ;;  %v6908_v14 = vld [vmem:[#allocation2 + $0x10] sm:$0xff]  ;;  %v169_v18 = vsub.s32 1, %v6920_v17  ;;  %v83_v20 = vsub.s32 0, %v6920_v17  ;;  %v248_v31 = vsub.s32 2, %v6920_v17 }
  0x13   :  { %6191 = vmatprep.subr.mxu1 %v6859_v4  ;;  %6180 = vmatprep.subr.mxu0 %v6861_v5  ;;  %v6926_v19 = vld [vmem:[%s7634_s4] sm:$0xff] }
  0x14   :  { %6192 = vmatpush3.msra.mxu1 %v6859_v4  ;;  %6181 = vmatpush3.msra.mxu0 %v6861_v5  ;;  %v6932_v21 = vrot.slane %v6926_v19, %v169_v18  ;;  %v6937_v22 = vrot.slane %v6926_v19, %v83_v20  ;;  %v6957_v32 = vrot.slane %v6926_v19, %v248_v31 }
  0x15   :  { %6193 = vmatprep.subr.mxu1 %v6870_v7  ;;  %6182 = vmatprep.subr.mxu0 %v6872_v8 }
  0x16   :  { %6194 = vmatpush3.msra.mxu1 %v6870_v7  ;;  %6195 = vmatprep.mubr.msk.f32.mxu1 %vm85_vm0, %v6874_v9 }
  0x17   :  { %6183 = vmatpush3.msra.mxu0 %v6872_v8  ;;  %6184 = vmatprep.mubr.msk.f32.mxu0 %vm85_vm0, %v6874_v9 }
  0x18   :  { %6196 = vmatmul.mubr.msk.f32.vlgmr.msra.gmra.mxu1 %vm85_vm0, %v6880_v10  ;;  %6185 = vmatmul.mubr.msk.f32.vlgmr.msra.gmra.mxu0 %vm85_vm0, %v6880_v10 }
  0x19   :  { %6198 = vmatprep.subr.mxu0 %v6887_v11  ;;  %6206 = vmatprep.mubr.msk.f32.mxu0 %vm85_vm0, %v6874_v9 }
  0x1a   :  { %6199 = vmatpush3.msra.mxu0 %v6887_v11  ;;  %6214 = vmatprep.subr.mxu1 %v6806_v15 }
  0x1b   :  { %6200 = vmatprep.subr.mxu0 %v6896_v12  ;;  %6216 = vmatprep.mubr.msk.f32.mxu1 %vm6807_vm1, %v6806_v15 }
  0x1c   :  { %6201 = vmatpush3.msra.mxu0 %v6896_v12  ;;  %749 = vrot.lane.b32.xlu1 %v6851_v2, %s6808_s27 }
  0x1d   :  { %6202 = vmatprep.subr.mxu0 %v6904_v13 }
  0x1e   :  { %6203 = vmatpush3.msra.mxu0 %v6904_v13 }
  0x1f   :  { %6204 = vmatprep.subr.mxu0 %v6908_v14 }
  0x20   :  { %6205 = vmatpush3.msra.mxu0 %v6908_v14  ;;  %656 = vrot.lane.b32.xlu1 %v6849_v1, %s6808_s27 }
  0x21   :  { %6207 = vmatmul.mubr.msk.f32.vlgmr.msra.gmra.mxu0 %vm85_vm0, %v6880_v10  ;;  %6209 = vmatprep.subr.mxu0 %v6806_v15 }
  0x22   :  { %6211 = vmatprep.mubr.msk.f32.mxu0 %vm6807_vm1, %v6806_v15 }
  0x24   :  { %747 = vrot.lane.b32.xlu1 %v6859_v4, %s6808_s27 }
  0x28   :  { %745 = vrot.lane.b32.xlu1 %v6870_v7, %s6808_s27 }
  0x8e   :  { %v750_v43 = vpop.permute.xlu1 %749 }
  0x92   :  { %v657_v44 = vpop.permute.xlu1 %656 }
  0x96   :  { %v748_v56 = vpop.permute.xlu1 %747 }
  0x9a   :  { %v746_v57 = vpop.permute.xlu1 %745 }
  0xd8   :  { %v6197_v23 = vpop.f32.mrf.mxu1  ;;  %v6186_v24 = vpop.f32.mrf.mxu0 }
  0xd9   :  { %v243_v25 = vadd.f32 %v6197_v23, %v6932_v21  ;;  %v164_v26 = vadd.f32 %v6186_v24, %v6937_v22 }
  0xda   :  { %v237_v27 = vpop.f32.mrf.mxu1  ;;  %v158_v29 = vpop.f32.mrf.mxu0 }
  0xdb   :  { %v238_v28 = vadd.f32 %v237_v27, %v6932_v21  ;;  %6215 = vmatpush3.xpose.msk.msra.mxu1 %vm325_vm2, %v243_v25  ;;  %v159_v30 = vadd.f32 %v158_v29, %v6937_v22 }
  0xdc   :  { %6224 = vmatprep.subr.mxu1 %v6806_v15 }
  0xdd   :  { %6210 = vmatpush3.xpose.msk.msra.mxu0 %vm325_vm2, %v238_v28 }
  0xde   :  { %6217 = vmatmul.mubr.msk.f32.vlgmr.msra.gmra.mxu1 %vm325_vm2, %v164_v26  ;;  %6219 = vmatprep.subr.mxu0 %v6806_v15 }
  0xdf   :  { %6226 = vmatprep.mubr.msk.f32.mxu1 %vm6807_vm1, %v6806_v15 }
  0xe0   :  { %6212 = vmatmul.mubr.msk.f32.vlgmr.msra.gmra.mxu0 %vm325_vm2, %v159_v30 }
  0xe1   :  { %6221 = vmatprep.mubr.msk.f32.mxu0 %vm6807_vm1, %v6806_v15  ;;  %v6208_v33 = vpop.f32.mrf.mxu0 }
  0xe2   :  { %v322_v34 = vadd.f32 %v6208_v33, %v6957_v32 }
  0xe3   :  { %v316_v35 = vpop.f32.mrf.mxu0 }
  0xe4   :  { %v317_v36 = vadd.f32 %v316_v35, %v6957_v32  ;;  %6225 = vmatpush3.msra.mxu1 %v322_v34 }
  0xe6   :  { %6220 = vmatpush3.msra.mxu0 %v317_v36 }
  0xe7   :  { %6229 = vmatprep.subr.mxu0 %v657_v44 }
 0x19e   :  { %v474_v37 = vpop.f32.mrf.mxu1 }
 0x19f   :  { %v481_v38 = vsel %vm325_vm2, %v474_v37, -inf }
 0x1a0   :  { %482 = vmax.xlane.f32.xlu0 %v481_v38  ;;  %v398_v39 = vpop.f32.mrf.mxu0  ;;  %v6218_v40 = vpop.f32.mrf.mxu1 }
 0x1a1   :  { %v478_v42 = vsel %vm325_vm2, %v398_v39, -inf }
 0x1a2   :  { %v6213_v41 = vpop.f32.mrf.mxu0 }
 0x1a4   :  { %479 = vmax.xlane.f32.xlu0 %v478_v42 }
 0x1ba   :  { %751 = vrot.lane.b32.xlu0 %v6847_v0, %s6808_s27 }
 0x1be   :  { %654 = vrot.lane.b32.xlu0 %v6855_v3, %s6808_s27 }
 0x1c2   :  { %652 = vrot.lane.b32.xlu0 %v6861_v5, %s6808_s27 }
 0x1c6   :  { %758 = vrot.lane.b32.xlu0 %v6932_v21, %s6808_s27 }
 0x1ca   :  { %846 = vrot.lane.b32.xlu0 %v6887_v11, %s6808_s27 }
 0x1ce   :  { %842 = vrot.lane.b32.xlu0 %v6904_v13, %s6808_s27 }
 0x229   :  { %v483_v45 = vpop.xlane.xlu0 %482 }
 0x22a   :  { %v485_v46 = vsub.f32 %v474_v37, %v483_v45 }
 0x22c   :  { %v488_v47 = vmul.f32 1.442695, %v485_v46 }
 0x22d   :  { %v480_v48 = vpop.xlane.xlu0 %479 }
 0x22e   :  { %6681 = vpow2.f32 %v488_v47  ;;  %v484_v49 = vsub.f32 %v398_v39, %v480_v48 }
 0x230   :  { %v486_v50 = vmul.f32 1.442695, %v484_v49 }
 0x231   :  { %v752_v55 = vpop.permute.xlu0 %751 }
 0x232   :  { %6683 = vpow2.f32 %v486_v50  ;;  %6240 = vmatprep.subr.mxu1 %v752_v55 }
 0x235   :  { %v655_v62 = vpop.permute.xlu0 %654 }
 0x239   :  { %v653_v16 = vpop.permute.xlu0 %652 }
 0x23b   :  { %v6682_v51 = vpop.eup %6681 }
 0x23c   :  { %v493_v52 = vsel %vm325_vm2, %v6682_v51, 0.0 }
 0x23d   :  { %494 = vadd.xlane.f32.xlu1 %v493_v52  ;;  %v759_v29 = vpop.permute.xlu0 %758 }
 0x23f   :  { %v6684_v53 = vpop.eup %6683 }
 0x240   :  { %v490_v54 = vsel %vm325_vm2, %v6684_v53, 0.0 }
 0x241   :  { %491 = vadd.xlane.f32.xlu1 %v490_v54  ;;  %v847_v40 = vpop.permute.xlu0 %846 }
 0x245   :  { %v843_v42 = vpop.permute.xlu0 %842 }
 0x252   :  { %650 = vrot.lane.b32.xlu1 %v6872_v8, %s6808_s27 }
 0x256   :  { %663 = vrot.lane.b32.xlu1 %v6937_v22, %s6808_s27 }
 0x25a   :  { %844 = vrot.lane.b32.xlu1 %v6896_v12, %s6808_s27 }
 0x25e   :  { %840 = vrot.lane.b32.xlu1 %v6908_v14, %s6808_s27 }
 0x2c6   :  { %v495_v58 = vpop.xlane.xlu1 %494 }
 0x2c7   :  { %6685 = vrcp.f32 %v495_v58 }
 0x2ca   :  { %v492_v59 = vpop.xlane.xlu1 %491 }
 0x2cb   :  { %6687 = vrcp.f32 %v492_v59 }
 0x2ce   :  { %v651_v23 = vpop.permute.xlu1 %650 }
 0x2d2   :  { %v664_v35 = vpop.permute.xlu1 %663 }
 0x2d4   :  { %v6686_v60 = vpop.eup %6685 }
 0x2d5   :  { %v499_v61 = vmul.f32 %v6686_v60, %v6682_v51 }
 0x2d6   :  { %v845_v41 = vpop.permute.xlu1 %844 }
 0x2d7   :  { %6227 = vmatmul.mubr.msk.f32.vlgmr.msra.gmra.mxu1 %vm325_vm2, %v499_v61 }
 0x2d8   :  { %v6688_v63 = vpop.eup %6687  ;;  %6241 = vmatpush3.msra.mxu1 %v752_v55  ;;  %6248 = vmatprep.mubr.msk.f32.mxu1 %vm85_vm0, %v6874_v9 }
 0x2d9   :  { %6242 = vmatprep.subr.mxu1 %v750_v43  ;;  %v498_v6 = vmul.f32 %v6688_v63, %v6684_v53 }
 0x2da   :  { %6243 = vmatpush3.msra.mxu1 %v750_v43  ;;  %v841_v43 = vpop.permute.xlu1 %840 }
 0x2db   :  { %6244 = vmatprep.subr.mxu1 %v748_v56  ;;  %6222 = vmatmul.mubr.msk.f32.vlgmr.msra.gmra.mxu0 %vm325_vm2, %v498_v6 }
 0x2dc   :  { %6230 = vmatpush3.msra.mxu0 %v657_v44  ;;  %6245 = vmatpush3.msra.mxu1 %v748_v56 }
 0x2dd   :  { %6231 = vmatprep.subr.mxu0 %v655_v62  ;;  %6246 = vmatprep.subr.mxu1 %v746_v57 }
 0x2de   :  { %6232 = vmatpush3.msra.mxu0 %v655_v62  ;;  %6247 = vmatpush3.msra.mxu1 %v746_v57 }
 0x2df   :  { %6233 = vmatprep.subr.mxu0 %v653_v16  ;;  %6249 = vmatmul.mubr.msk.f32.vlgmr.msra.gmra.mxu1 %vm85_vm0, %v6880_v10 }
 0x2e0   :  { %6234 = vmatpush3.msra.mxu0 %v653_v16  ;;  %6237 = vmatprep.mubr.msk.f32.mxu0 %vm85_vm0, %v6874_v9 }
 0x2e1   :  { %6235 = vmatprep.subr.mxu0 %v651_v23  ;;  %6262 = vmatprep.subr.mxu1 %v6806_v15 }
 0x2e2   :  { %6236 = vmatpush3.msra.mxu0 %v651_v23  ;;  %6264 = vmatprep.mubr.msk.f32.mxu1 %vm6807_vm1, %v6806_v15 }
 0x2e3   :  { %6238 = vmatmul.mubr.msk.f32.vlgmr.msra.gmra.mxu0 %vm85_vm0, %v6880_v10  ;;  %6251 = vmatprep.subr.mxu0 %v847_v40 }
 0x2e4   :  { %6259 = vmatprep.mubr.msk.f32.mxu0 %vm85_vm0, %v6874_v9  ;;  %6252 = vmatpush3.msra.mxu0 %v847_v40 }
 0x2e5   :  { %6253 = vmatprep.subr.mxu0 %v845_v41 }
 0x2e6   :  { %6254 = vmatpush3.msra.mxu0 %v845_v41 }
 0x2e7   :  { %6255 = vmatprep.subr.mxu0 %v843_v42 }
 0x2e8   :  { %6256 = vmatpush3.msra.mxu0 %v843_v42 }
 0x2e9   :  { %6257 = vmatprep.subr.mxu0 %v841_v43 }
 0x2ea   :  { %6258 = vmatpush3.msra.mxu0 %v841_v43 }
 0x2eb   :  { %6260 = vmatmul.mubr.msk.f32.vlgmr.msra.gmra.mxu0 %vm85_vm0, %v6880_v10  ;;  %6272 = vmatprep.subr.mxu0 %v6806_v15 }
 0x2ec   :  { %6274 = vmatprep.mubr.msk.f32.mxu0 %vm6807_vm1, %v6806_v15 }
 0x397   :  { %v7008_v24 = vpop.f32.mrf.mxu1 }
 0x399   :  { %v6228_v25 = vpop.f32.mrf.mxu1 }
 0x39a   :  { %v38_v25 = vld [vmem:[#allocation2 + $0x18] sm:$0xff] }
 0x39b   :  { %v7010_v26 = vpop.f32.mrf.mxu0 }
 0x39d   :  { %v6223_v27 = vpop.f32.mrf.mxu0 }
 0x39e   :  { %v47_v27 = vld [vmem:[#allocation2 + $0x60] sm:$0xff] }
 0x39f   :  { %v6250_v28 = vpop.f32.mrf.mxu1 }
 0x3a0   :  { %v833_v38 = vadd.f32 %v6250_v28, %v759_v29 }
 0x3a1   :  { %v827_v30 = vpop.f32.mrf.mxu1 }
 0x3a2   :  { %v828_v33 = vadd.f32 %v827_v30, %v759_v29 }
 0x3a3   :  { %v6239_v34 = vpop.f32.mrf.mxu0 }
 0x3a4   :  { %6263 = vmatpush3.xpose.msk.msra.mxu1 %vm325_vm2, %v828_v33  ;;  %v738_v39 = vadd.f32 %v6239_v34, %v664_v35 }
 0x3a5   :  { %v732_v36 = vpop.f32.mrf.mxu0  ;;  %6267 = vmatprep.subr.mxu1 %v6806_v15 }
 0x3a6   :  { %v733_v37 = vadd.f32 %v732_v36, %v664_v35 }
 0x3a8   :  { %6265 = vmatmul.mubr.msk.f32.vlgmr.msra.gmra.mxu1 %vm325_vm2, %v733_v37 }
 0x3a9   :  { %6268 = vmatpush3.xpose.msk.msra.mxu1 %vm325_vm2, %v833_v38  ;;  %6269 = vmatprep.mubr.msk.f32.mxu1 %vm6807_vm1, %v6806_v15 }
 0x3aa   :  { %6277 = vmatprep.subr.mxu1 %v6806_v15 }
 0x3ab   :  { %v6261_v61 = vpop.f32.mrf.mxu0 }
 0x3ac   :  { %6270 = vmatmul.mubr.msk.f32.vlgmr.msra.gmra.mxu1 %vm325_vm2, %v738_v39 }
 0x3ad   :  { %6279 = vmatprep.mubr.msk.f32.mxu1 %vm6807_vm1, %v6806_v15  ;;  %v922_v63 = vpop.f32.mrf.mxu0 }
 0x468   :  { %v1003_v44 = vpop.f32.mrf.mxu1 }
 0x469   :  { %v1083_v45 = vsel %vm325_vm2, %v1003_v44, -inf }
 0x46a   :  { %1084 = vmax.xlane.f32.xlu0 %v1083_v45  ;;  %v6266_v46 = vpop.f32.mrf.mxu1 }
 0x46c   :  { %v1079_v47 = vpop.f32.mrf.mxu1 }
 0x46d   :  { %v1086_v48 = vsel %vm325_vm2, %v1079_v47, -inf }
 0x46e   :  { %1087 = vmax.xlane.f32.xlu1 %v1086_v48  ;;  %v6271_v49 = vpop.f32.mrf.mxu1 }
 0x47f   :  { %1509 = vrot.lane.b32.xlu1 %v6847_v0, %s6809_s28 }
 0x483   :  { %1507 = vrot.lane.b32.xlu1 %v6851_v2, %s6809_s28 }
 0x487   :  { %1419 = vrot.lane.b32.xlu1 %v6849_v1, %s6809_s28 }
 0x48b   :  { %1417 = vrot.lane.b32.xlu1 %v6855_v3, %s6809_s28 }
 0x48f   :  { %1415 = vrot.lane.b32.xlu1 %v6861_v5, %s6809_s28 }
 0x493   :  { %1515 = vrot.lane.b32.xlu1 %v6932_v21, %s6809_s28 }
 0x497   :  { %1599 = vrot.lane.b32.xlu1 %v6887_v11, %s6809_s28 }
 0x49b   :  { %1595 = vrot.lane.b32.xlu1 %v6904_v13, %s6809_s28 }
 0x4f3   :  { %v1085_v50 = vpop.xlane.xlu0 %1084 }
 0x4f4   :  { %v1089_v51 = vsub.f32 %v1003_v44, %v1085_v50 }
 0x4f6   :  { %v1091_v52 = vmul.f32 1.442695, %v1089_v51 }
 0x4f7   :  { %v1088_v53 = vpop.xlane.xlu1 %1087 }
 0x4f8   :  { %6689 = vpow2.f32 %v1091_v52  ;;  %v1090_v54 = vsub.f32 %v1079_v47, %v1088_v53 }
 0x4fa   :  { %v1093_v55 = vmul.f32 1.442695, %v1090_v54 }
 0x4fb   :  { %v1510_v28 = vpop.permute.xlu1 %1509 }
 0x4fc   :  { %6691 = vpow2.f32 %v1093_v55 }
 0x4ff   :  { %v1508_v33 = vpop.permute.xlu1 %1507 }
 0x503   :  { %v1420_v36 = vpop.permute.xlu1 %1419 }
 0x505   :  { %v6690_v56 = vpop.eup %6689 }
 0x506   :  { %v1095_v57 = vsel %vm325_vm2, %v6690_v56, 0.0 }
 0x507   :  { %1096 = vadd.xlane.f32.xlu0 %v1095_v57 }
 0x509   :  { %v6692_v58 = vpop.eup %6691 }
 0x50a   :  { %v1098_v59 = vsel %vm325_vm2, %v6692_v58, 0.0 }
 0x50b   :  { %1099 = vadd.xlane.f32.xlu0 %v1098_v59 }
 0x521   :  { %853 = vrot.lane.b32.xlu0 %v6957_v32, %s6808_s27 }
 0x525   :  { %1505 = vrot.lane.b32.xlu0 %v6859_v4, %s6809_s28 }
 0x529   :  { %1503 = vrot.lane.b32.xlu0 %v6870_v7, %s6809_s28 }
 0x52d   :  { %1413 = vrot.lane.b32.xlu0 %v6872_v8, %s6809_s28 }
 0x531   :  { %1425 = vrot.lane.b32.xlu0 %v6937_v22, %s6809_s28 }
 0x535   :  { %1597 = vrot.lane.b32.xlu0 %v6896_v12, %s6809_s28 }
 0x539   :  { %1593 = vrot.lane.b32.xlu0 %v6908_v14, %s6809_s28 }
 0x590   :  { %v1097_v60 = vpop.xlane.xlu0 %1096 }
 0x591   :  { %6693 = vrcp.f32 %v1097_v60 }
 0x594   :  { %v1100_v62 = vpop.xlane.xlu0 %1099 }
 0x595   :  { %6695 = vrcp.f32 %v1100_v62 }
 0x598   :  { %v854_v6 = vpop.permute.xlu0 %853 }
 0x599   :  { %v923_v16 = vadd.f32 %v922_v63, %v854_v6  ;;  %v928_v23 = vadd.f32 %v6261_v61, %v854_v6 }
 0x59b   :  { %6273 = vmatpush3.msra.mxu0 %v923_v16  ;;  %6278 = vmatpush3.msra.mxu1 %v928_v23 }
 0x59c   :  { %6287 = vmatprep.subr.mxu1 %v38_v25  ;;  %6282 = vmatprep.subr.mxu0 %v47_v27  ;;  %v1506_v37 = vpop.permute.xlu0 %1505 }
 0x59e   :  { %v6694_v29 = vpop.eup %6693 }
 0x59f   :  { %v1103_v30 = vmul.f32 %v6694_v29, %v6690_v56 }
 0x5a0   :  { %v1504_v38 = vpop.permute.xlu0 %1503 }
 0x5a1   :  { %6275 = vmatmul.mubr.msk.f32.vlgmr.msra.gmra.mxu0 %vm325_vm2, %v1103_v30 }
 0x5a2   :  { %v6696_v34 = vpop.eup %6695  ;;  %6283 = vmatpush3.msra.mxu0 %v47_v27 }
 0x5a3   :  { %v1104_v35 = vmul.f32 %v6696_v34, %v6692_v58  ;;  %6292 = vmatprep.subr.mxu0 %v1420_v36 }
 0x5a4   :  { %v1414_v43 = vpop.permute.xlu0 %1413 }
 0x5a5   :  { %6280 = vmatmul.mubr.msk.f32.vlgmr.msra.gmra.mxu1 %vm325_vm2, %v1104_v35 }
 0x5a6   :  { %6289 = vmatprep.mubr.msk.f32.mxu1 %vm325_vm2, %v7010_v26  ;;  %6288 = vmatpush3.msra.mxu1 %v38_v25  ;;  %v1418_v26 = vpop.permute.xlu1 %1417 }
 0x5a7   :  { %6303 = vmatprep.subr.mxu1 %v1510_v28 }
 0x5a8   :  { %v1426_v53 = vpop.permute.xlu0 %1425 }
 0x5a9   :  { %6290 = vmatmul.mubr.msk.f32.vlgmr.msra.gmra.mxu1 %vm325_vm2, %v7008_v24 }
 0x5aa   :  { %6304 = vmatpush3.msra.mxu1 %v1510_v28  ;;  %6311 = vmatprep.mubr.msk.f32.mxu1 %vm85_vm0, %v6874_v9  ;;  %v1416_v42 = vpop.permute.xlu1 %1415 }
 0x5ab   :  { %6305 = vmatprep.subr.mxu1 %v1508_v33 }
 0x5ac   :  { %6306 = vmatpush3.msra.mxu1 %v1508_v33  ;;  %v1598_v59 = vpop.permute.xlu0 %1597 }
 0x5ad   :  { %6307 = vmatprep.subr.mxu1 %v1506_v37 }
 0x5ae   :  { %6308 = vmatpush3.msra.mxu1 %v1506_v37  ;;  %v1516_v47 = vpop.permute.xlu1 %1515 }
 0x5af   :  { %6309 = vmatprep.subr.mxu1 %v1504_v38 }
 0x5b0   :  { %6310 = vmatpush3.msra.mxu1 %v1504_v38  ;;  %v1594_v61 = vpop.permute.xlu0 %1593 }
 0x5b1   :  { %6312 = vmatmul.mubr.msk.f32.vlgmr.msra.gmra.mxu1 %vm85_vm0, %v6880_v10  ;;  %6325 = vmatprep.subr.mxu1 %v6806_v15 }
 0x5b2   :  { %6327 = vmatprep.mubr.msk.f32.mxu1 %vm6807_vm1, %v6806_v15  ;;  %v1600_v58 = vpop.permute.xlu1 %1599 }
 0x5b6   :  { %v1596_v60 = vpop.permute.xlu1 %1595 }
 0x661   :  { %v1174_v24 = vpop.f32.mrf.mxu0 }
 0x662   :  { %6284 = vmatprep.mubr.msk.f32.mxu0 %vm325_vm2, %v1174_v24 }
 0x663   :  { %v6276_v39 = vpop.f32.mrf.mxu0 }
 0x665   :  { %v1247_v40 = vpop.f32.mrf.mxu1 }
 0x666   :  { %6285 = vmatmul.mubr.msk.f32.vlgmr.msra.gmra.mxu0 %vm325_vm2, %v1247_v40 }
 0x667   :  { %6293 = vmatpush3.msra.mxu0 %v1420_v36  ;;  %v6281_v41 = vpop.f32.mrf.mxu1  ;;  %6300 = vmatprep.mubr.msk.f32.mxu0 %vm85_vm0, %v6874_v9 }
 0x668   :  { %6294 = vmatprep.subr.mxu0 %v1418_v26 }
 0x669   :  { %6295 = vmatpush3.msra.mxu0 %v1418_v26  ;;  %v7082_v44 = vpop.f32.mrf.mxu1 }
 0x66a   :  { %6296 = vmatprep.subr.mxu0 %v1416_v42 }
 0x66b   :  { %6297 = vmatpush3.msra.mxu0 %v1416_v42  ;;  %v7084_v45 = vpop.f32.mrf.mxu1 }
 0x66c   :  { %6298 = vmatprep.subr.mxu0 %v1414_v43 }
 0x66d   :  { %6299 = vmatpush3.msra.mxu0 %v1414_v43 }
 0x66e   :  { %6301 = vmatmul.mubr.msk.f32.vlgmr.msra.gmra.mxu0 %vm85_vm0, %v6880_v10  ;;  %6314 = vmatprep.subr.mxu0 %v1600_v58 }
 0x66f   :  { %6322 = vmatprep.mubr.msk.f32.mxu0 %vm85_vm0, %v6874_v9  ;;  %6315 = vmatpush3.msra.mxu0 %v1600_v58 }
 0x670   :  { %6316 = vmatprep.subr.mxu0 %v1598_v59 }
 0x671   :  { %v6313_v46 = vpop.f32.mrf.mxu1  ;;  %6317 = vmatpush3.msra.mxu0 %v1598_v59 }
 0x672   :  { %v1590_v56 = vadd.f32 %v6313_v46, %v1516_v47  ;;  %6318 = vmatprep.subr.mxu0 %v1596_v60 }
 0x673   :  { %v1584_v48 = vpop.f32.mrf.mxu1  ;;  %6319 = vmatpush3.msra.mxu0 %v1596_v60 }
 0x674   :  { %v1585_v49 = vadd.f32 %v1584_v48, %v1516_v47  ;;  %6320 = vmatprep.subr.mxu0 %v1594_v61 }
 0x675   :  { %6321 = vmatpush3.msra.mxu0 %v1594_v61 }
 0x676   :  { %6326 = vmatpush3.xpose.msk.msra.mxu1 %vm325_vm2, %v1585_v49  ;;  %6323 = vmatmul.mubr.msk.f32.vlgmr.msra.gmra.mxu0 %vm85_vm0, %v6880_v10 }
 0x677   :  { %6330 = vmatprep.subr.mxu1 %v6806_v15  ;;  %6335 = vmatprep.subr.mxu0 %v6806_v15 }
 0x678   :  { %6337 = vmatprep.mubr.msk.f32.mxu0 %vm6807_vm1, %v6806_v15 }
 0x726   :  { %v7088_v50 = vpop.f32.mrf.mxu0 }
 0x727   :  { %v1410_v49 = vadd.f32 %v7082_v44, %v7088_v50 }
 0x728   :  { %v7090_v51 = vpop.f32.mrf.mxu0 }
 0x72e   :  { %v6302_v52 = vpop.f32.mrf.mxu0 }
 0x72f   :  { %v1500_v57 = vadd.f32 %v6302_v52, %v1426_v53 }
 0x730   :  { %v1494_v54 = vpop.f32.mrf.mxu0 }
 0x731   :  { %v1495_v55 = vadd.f32 %v1494_v54, %v1426_v53  ;;  %v1405_v53 = vadd.f32 %v7084_v45, %v7090_v51 }
 0x733   :  { %6328 = vmatmul.mubr.msk.f32.vlgmr.msra.gmra.mxu1 %vm325_vm2, %v1495_v55 }
 0x734   :  { %6331 = vmatpush3.xpose.msk.msra.mxu1 %vm325_vm2, %v1590_v56  ;;  %6332 = vmatprep.mubr.msk.f32.mxu1 %vm6807_vm1, %v6806_v15 }
 0x735   :  { %6340 = vmatprep.subr.mxu1 %v6806_v15 }
 0x736   :  { %v6324_v24 = vpop.f32.mrf.mxu0 }
 0x737   :  { %6333 = vmatmul.mubr.msk.f32.vlgmr.msra.gmra.mxu1 %vm325_vm2, %v1500_v57 }
 0x738   :  { %6342 = vmatprep.mubr.msk.f32.mxu1 %vm6807_vm1, %v6806_v15  ;;  %v1674_v40 = vpop.f32.mrf.mxu0 }
 0x7f3   :  { %v1755_v62 = vpop.f32.mrf.mxu1 }
 0x7f4   :  { %v1835_v63 = vsel %vm325_vm2, %v1755_v62, -inf }
 0x7f5   :  { %1836 = vmax.xlane.f32.xlu1 %v1835_v63  ;;  %v6329_v6 = vpop.f32.mrf.mxu1 }
 0x7f7   :  { %v1831_v16 = vpop.f32.mrf.mxu1 }
 0x7f8   :  { %v1838_v23 = vsel %vm325_vm2, %v1831_v16, -inf }
 0x7f9   :  { %1839 = vmax.xlane.f32.xlu0 %v1838_v23  ;;  %v6334_v25 = vpop.f32.mrf.mxu1 }
 0x806   :  { %1605 = vrot.lane.b32.xlu1 %v6957_v32, %s6809_s28 }
 0x80a   :  { %2180 = vrot.lane.b32.xlu1 %v6851_v2, %s6810_s29 }
 0x80e   :  { %2092 = vrot.lane.b32.xlu1 %v6849_v1, %s6810_s29 }
 0x812   :  { %2178 = vrot.lane.b32.xlu1 %v6859_v4, %s6810_s29 }
 0x816   :  { %2176 = vrot.lane.b32.xlu1 %v6870_v7, %s6810_s29 }
 0x81a   :  { %2086 = vrot.lane.b32.xlu1 %v6872_v8, %s6810_s29 }
 0x81e   :  { %2098 = vrot.lane.b32.xlu1 %v6937_v22, %s6810_s29 }
 0x822   :  { %2270 = vrot.lane.b32.xlu1 %v6896_v12, %s6810_s29  ;;  %v56_v12 = vld [vmem:[#allocation2 + $0xa8] sm:$0xff] }
 0x826   :  { %2266 = vrot.lane.b32.xlu1 %v6908_v14, %s6810_s29 }
 0x87e   :  { %v1837_v27 = vpop.xlane.xlu1 %1836 }
 0x87f   :  { %v1841_v28 = vsub.f32 %v1755_v62, %v1837_v27 }
 0x881   :  { %v1843_v29 = vmul.f32 1.442695, %v1841_v28 }
 0x882   :  { %v1840_v30 = vpop.xlane.xlu0 %1839  ;;  %v1606_v26 = vpop.permute.xlu1 %1605 }
 0x883   :  { %6697 = vpow2.f32 %v1843_v29  ;;  %v1842_v33 = vsub.f32 %v1831_v16, %v1840_v30  ;;  %v1680_v39 = vadd.f32 %v6324_v24, %v1606_v26  ;;  %v1675_v41 = vadd.f32 %v1674_v40, %v1606_v26 }
 0x885   :  { %v1845_v34 = vmul.f32 1.442695, %v1842_v33  ;;  %6341 = vmatpush3.msra.mxu1 %v1680_v39  ;;  %6336 = vmatpush3.msra.mxu0 %v1675_v41 }
 0x886   :  { %v2181_v2 = vpop.permute.xlu1 %2180  ;;  %6345 = vmatprep.subr.mxu0 %v56_v12 }
 0x887   :  { %6699 = vpow2.f32 %v1845_v34 }
 0x890   :  { %v6698_v35 = vpop.eup %6697 }
 0x891   :  { %v1847_v36 = vsel %vm325_vm2, %v6698_v35, 0.0 }
 0x892   :  { %1848 = vadd.xlane.f32.xlu0 %v1847_v36 }
 0x894   :  { %v6700_v37 = vpop.eup %6699 }
 0x895   :  { %v1850_v38 = vsel %vm325_vm2, %v6700_v37, 0.0 }
 0x896   :  { %1851 = vadd.xlane.f32.xlu0 %v1850_v38 }
 0x8ac   :  { %2182 = vrot.lane.b32.xlu0 %v6847_v0, %s6810_s29 }
 0x8b0   :  { %2090 = vrot.lane.b32.xlu0 %v6855_v3, %s6810_s29  ;;  %v2093_v3 = vpop.permute.xlu1 %2092 }
 0x8b1   :  { %6350 = vmatprep.subr.mxu1 %v2093_v3 }
 0x8b4   :  { %2088 = vrot.lane.b32.xlu0 %v6861_v5, %s6810_s29 }
 0x8b8   :  { %2188 = vrot.lane.b32.xlu0 %v6932_v21, %s6810_s29 }
 0x8bc   :  { %2272 = vrot.lane.b32.xlu0 %v6887_v11, %s6810_s29 }
 0x8c0   :  { %2268 = vrot.lane.b32.xlu0 %v6904_v13, %s6810_s29  ;;  %v2179_v13 = vpop.permute.xlu1 %2178 }
 0x8c4   :  { %v2177_v21 = vpop.permute.xlu1 %2176 }
 0x8c8   :  { %v2087_v42 = vpop.permute.xlu1 %2086 }
 0x8cc   :  { %v2099_v62 = vpop.permute.xlu1 %2098 }
 0x8d0   :  { %v2271_v51 = vpop.permute.xlu1 %2270 }
 0x8d4   :  { %v2267_v23 = vpop.permute.xlu1 %2266 }
 0x91b   :  { %v1849_v0 = vpop.xlane.xlu0 %1848 }
 0x91c   :  { %6701 = vrcp.f32 %v1849_v0 }
 0x91f   :  { %v1852_v1 = vpop.xlane.xlu0 %1851 }
 0x920   :  { %6703 = vrcp.f32 %v1852_v1 }
 0x923   :  { %v2183_v11 = vpop.permute.xlu0 %2182 }
 0x927   :  { %v2091_v14 = vpop.permute.xlu0 %2090 }
 0x929   :  { %v6702_v4 = vpop.eup %6701 }
 0x92a   :  { %v1855_v5 = vmul.f32 %v6702_v4, %v6698_v35 }
 0x92b   :  { %v2089_v22 = vpop.permute.xlu0 %2088 }
 0x92c   :  { %6338 = vmatmul.mubr.msk.f32.vlgmr.msra.gmra.mxu0 %vm325_vm2, %v1855_v5 }
 0x92d   :  { %v6704_v7 = vpop.eup %6703  ;;  %6346 = vmatpush3.msra.mxu0 %v56_v12 }
 0x92e   :  { %v1856_v8 = vmul.f32 %v6704_v7, %v6700_v37  ;;  %6361 = vmatprep.subr.mxu0 %v2183_v11 }
 0x92f   :  { %v2189_v59 = vpop.permute.xlu0 %2188 }
 0x930   :  { %6343 = vmatmul.mubr.msk.f32.vlgmr.msra.gmra.mxu1 %vm325_vm2, %v1856_v8 }
 0x931   :  { %6351 = vmatpush3.msra.mxu1 %v2093_v3  ;;  %6358 = vmatprep.mubr.msk.f32.mxu1 %vm85_vm0, %v6874_v9 }
 0x932   :  { %6352 = vmatprep.subr.mxu1 %v2091_v14 }
 0x933   :  { %6353 = vmatpush3.msra.mxu1 %v2091_v14  ;;  %v2273_v50 = vpop.permute.xlu0 %2272 }
 0x934   :  { %6354 = vmatprep.subr.mxu1 %v2089_v22 }
 0x935   :  { %6355 = vmatpush3.msra.mxu1 %v2089_v22 }
 0x936   :  { %6356 = vmatprep.subr.mxu1 %v2087_v42 }
 0x937   :  { %6357 = vmatpush3.msra.mxu1 %v2087_v42  ;;  %v2269_v16 = vpop.permute.xlu0 %2268 }
 0x938   :  { %6359 = vmatmul.mubr.msk.f32.vlgmr.msra.gmra.mxu1 %vm85_vm0, %v6880_v10  ;;  %6372 = vmatprep.subr.mxu1 %v2273_v50 }
 0x939   :  { %6380 = vmatprep.mubr.msk.f32.mxu1 %vm85_vm0, %v6874_v9  ;;  %6373 = vmatpush3.msra.mxu1 %v2273_v50  ;;  %v7232_v50 = vld [vmem:[#allocation2 + $0x28] sm:$0xff] }
 0x93a   :  { %6374 = vmatprep.subr.mxu1 %v2271_v51 }
 0x93b   :  { %6375 = vmatpush3.msra.mxu1 %v2271_v51  ;;  %v7235_v51 = vld [vmem:[#allocation2 + $0x68] sm:$0xff] }
 0x93c   :  { %6376 = vmatprep.subr.mxu1 %v2269_v16 }
 0x93d   :  { %6377 = vmatpush3.msra.mxu1 %v2269_v16 }
 0x93e   :  { %6378 = vmatprep.subr.mxu1 %v2267_v23 }
 0x93f   :  { %6379 = vmatpush3.msra.mxu1 %v2267_v23  ;;  %v7253_v23 = vld [vmem:[#allocation2 + $0x20] sm:$0xff] }
 0x940   :  { %6381 = vmatmul.mubr.msk.f32.vlgmr.msra.gmra.mxu1 %vm85_vm0, %v6880_v10  ;;  %6393 = vmatprep.subr.mxu1 %v6806_v15 }
 0x941   :  { %6395 = vmatprep.mubr.msk.f32.mxu1 %vm6807_vm1, %v6806_v15 }
 0x9ec   :  { %v1926_v43 = vpop.f32.mrf.mxu0 }
 0x9ed   :  { %6347 = vmatprep.mubr.msk.f32.mxu0 %vm325_vm2, %v1926_v43  ;;  %v2761_v43 = vsub.s32 3, %v6920_v17 }
 0x9ee   :  { %v6339_v46 = vpop.f32.mrf.mxu0 }
 0x9ef   :  { %v2762_v46 = vrot.slane %v6926_v19, %v2761_v43 }
 0x9f0   :  { %v1999_v47 = vpop.f32.mrf.mxu1 }
 0x9f1   :  { %6348 = vmatmul.mubr.msk.f32.vlgmr.msra.gmra.mxu0 %vm325_vm2, %v1999_v47 }
 0x9f2   :  { %6362 = vmatpush3.msra.mxu0 %v2183_v11  ;;  %v6344_v48 = vpop.f32.mrf.mxu1  ;;  %6369 = vmatprep.mubr.msk.f32.mxu0 %vm85_vm0, %v6874_v9 }
 0x9f3   :  { %6363 = vmatprep.subr.mxu0 %v2181_v2 }
 0x9f4   :  { %6364 = vmatpush3.msra.mxu0 %v2181_v2 }
 0x9f5   :  { %6365 = vmatprep.subr.mxu0 %v2179_v13 }
 0x9f6   :  { %6366 = vmatpush3.msra.mxu0 %v2179_v13 }
 0x9f7   :  { %6367 = vmatprep.subr.mxu0 %v2177_v21 }
 0x9f8   :  { %6368 = vmatpush3.msra.mxu0 %v2177_v21  ;;  %v6360_v57 = vpop.f32.mrf.mxu1 }
 0x9f9   :  { %6370 = vmatmul.mubr.msk.f32.vlgmr.msra.gmra.mxu0 %vm85_vm0, %v6880_v10  ;;  %6383 = vmatprep.subr.mxu0 %v6806_v15  ;;  %v2173_v45 = vadd.f32 %v6360_v57, %v2099_v62 }
 0x9fa   :  { %6385 = vmatprep.mubr.msk.f32.mxu0 %vm6807_vm1, %v6806_v15  ;;  %v2167_v63 = vpop.f32.mrf.mxu1 }
 0x9fb   :  { %v2168_v6 = vadd.f32 %v2167_v63, %v2099_v62  ;;  %v7216_v62 = vld [vmem:[#allocation2 + $0xf8] sm:$0xff]  ;;  %v7218_v63 = vld [vmem:[#allocation2 + $0xb0] sm:$0xff] }
 0xa00   :  { %v6382_v1 = vpop.f32.mrf.mxu1 }
 0xa02   :  { %v2347_v3 = vpop.f32.mrf.mxu1 }
 0xab1   :  { %v6349_v52 = vpop.f32.mrf.mxu0 }
 0xab2   :  { %v7160_v54 = vadd.f32 %v6349_v52, %v1410_v49 }
 0xab3   :  { %v2075_v55 = vpop.f32.mrf.mxu0 }
 0xab4   :  { %v7162_v56 = vadd.f32 %v2075_v55, %v1405_v53 }
 0xab9   :  { %v6371_v58 = vpop.f32.mrf.mxu0 }
 0xaba   :  { %v2263_v44 = vadd.f32 %v6371_v58, %v2189_v59 }
 0xabb   :  { %v2257_v60 = vpop.f32.mrf.mxu0 }
 0xabc   :  { %v2258_v61 = vadd.f32 %v2257_v60, %v2189_v59  ;;  %v7211_v60 = vld [vmem:[#allocation2 + $0x100] sm:$0xff] }
 0xabe   :  { %6384 = vmatpush3.xpose.msk.msra.mxu0 %vm325_vm2, %v2258_v61  ;;  %v7213_v61 = vld [vmem:[#allocation2 + $0xb8] sm:$0xff] }
 0xabf   :  { %6388 = vmatprep.subr.mxu0 %v6806_v15 }
 0xac1   :  { %6386 = vmatmul.mubr.msk.f32.vlgmr.msra.gmra.mxu0 %vm325_vm2, %v2168_v6  ;;  %v7221_v6 = vld [vmem:[#allocation2 + $0x70] sm:$0xff] }
 0xac2   :  { %6389 = vmatpush3.xpose.msk.msra.mxu0 %vm325_vm2, %v2263_v44  ;;  %6390 = vmatprep.mubr.msk.f32.mxu0 %vm6807_vm1, %v6806_v15  ;;  %v5925_v44 = vld [vmem:[%s7631_s1] sm:$0xff]  }
 0xac3   :  { %6398 = vmatprep.subr.mxu0 %v6806_v15  ;;  %v7240_v16 = vunpack.c.h.bf16 %v5925_v44 }
 0xac5   :  { %6391 = vmatmul.mubr.msk.f32.vlgmr.msra.gmra.mxu0 %vm325_vm2, %v2173_v45  ;;  %v7229_v45 = vunpack.c.l.bf16 %v5925_v44 }
 0xac6   :  { %6400 = vmatprep.mubr.msk.f32.mxu0 %vm6807_vm1, %v6806_v15 }
 0xb81   :  { %v2428_v25 = vpop.f32.mrf.mxu0 }
 0xb82   :  { %v2508_v27 = vsel %vm325_vm2, %v2428_v25, -inf }
 0xb83   :  { %2509 = vmax.xlane.f32.xlu0 %v2508_v27  ;;  %v6387_v28 = vpop.f32.mrf.mxu0 }
 0xb85   :  { %v2504_v29 = vpop.f32.mrf.mxu0 }
 0xb86   :  { %v2511_v30 = vsel %vm325_vm2, %v2504_v29, -inf }
 0xb87   :  { %2512 = vmax.xlane.f32.xlu1 %v2511_v30  ;;  %v6392_v33 = vpop.f32.mrf.mxu0 }
 0xc0c   :  { %v2510_v34 = vpop.xlane.xlu0 %2509 }
 0xc0d   :  { %v2514_v35 = vsub.f32 %v2428_v25, %v2510_v34 }
 0xc0f   :  { %v2516_v36 = vmul.f32 1.442695, %v2514_v35 }
 0xc10   :  { %v2513_v37 = vpop.xlane.xlu1 %2512 }
 0xc11   :  { %6705 = vpow2.f32 %v2516_v36  ;;  %v2515_v38 = vsub.f32 %v2504_v29, %v2513_v37 }
 0xc13   :  { %v2518_v24 = vmul.f32 1.442695, %v2515_v38 }
 0xc15   :  { %6707 = vpow2.f32 %v2518_v24 }
 0xc1e   :  { %v6706_v26 = vpop.eup %6705 }
 0xc1f   :  { %v2520_v39 = vsel %vm325_vm2, %v6706_v26, 0.0 }
 0xc20   :  { %2521 = vadd.xlane.f32.xlu0 %v2520_v39 }
 0xc22   :  { %v6708_v40 = vpop.eup %6707 }
 0xc23   :  { %v2523_v41 = vsel %vm325_vm2, %v6708_v40, 0.0 }
 0xc24   :  { %2524 = vadd.xlane.f32.xlu0 %v2523_v41 }
 0xc3a   :  { %2278 = vrot.lane.b32.xlu0 %v6957_v32, %s6810_s29  ;;  %v65_v32 = vld [vmem:[#allocation2 + $0xf0] sm:$0xff] }
 0xca9   :  { %v2522_v0 = vpop.xlane.xlu0 %2521 }
 0xcaa   :  { %6709 = vrcp.f32 %v2522_v0  ;;  %v2801_v0 = vsub.s32 4, %v6920_v17 }
 0xcad   :  { %v2525_v2 = vpop.xlane.xlu0 %2524 }
 0xcae   :  { %6711 = vrcp.f32 %v2525_v2 }
 0xcb1   :  { %v2279_v4 = vpop.permute.xlu0 %2278 }
 0xcb2   :  { %v2348_v5 = vadd.f32 %v2347_v3, %v2279_v4  ;;  %v2353_v7 = vadd.f32 %v6382_v1, %v2279_v4  ;;  %v2807_v1 = vsub.s32 5, %v6920_v17  ;;  %v6757_v3 = vld [vmem:[%s7634_s4] sm:$0xff] }
 0xcb3   :  { %v2802_v4 = vrot.slane %v6757_v3, %v2801_v0 }
 0xcb4   :  { %6394 = vmatpush3.msra.mxu1 %v2348_v5  ;;  %6399 = vmatpush3.msra.mxu0 %v2353_v7 }
 0xcb5   :  { %6403 = vmatprep.subr.mxu1 %v65_v32  ;;  %6408 = vmatprep.subr.mxu0 %v7216_v62 }
 0xcb7   :  { %v6710_v8 = vpop.eup %6709 }
 0xcb8   :  { %v2528_v11 = vmul.f32 %v6710_v8, %v6706_v26  ;;  %v2808_v8 = vrot.slane %v6757_v3, %v2807_v1 }
 0xcba   :  { %6396 = vmatmul.mubr.msk.f32.vlgmr.msra.gmra.mxu1 %vm325_vm2, %v2528_v11 }
 0xcbb   :  { %v6712_v12 = vpop.eup %6711  ;;  %6404 = vmatpush3.msra.mxu1 %v65_v32 }
 0xcbc   :  { %v2529_v13 = vmul.f32 %v6712_v12, %v6708_v40  ;;  %6419 = vmatprep.subr.mxu1 %v7211_v60 }
 0xcbe   :  { %6401 = vmatmul.mubr.msk.f32.vlgmr.msra.gmra.mxu0 %vm325_vm2, %v2529_v13 }
 0xcbf   :  { %6409 = vmatpush3.msra.mxu0 %v7216_v62 }
 0xcc0   :  { %6410 = vmatprep.subr.mxu0 %v7218_v63 }
 0xcc1   :  { %6411 = vmatpush3.msra.mxu0 %v7218_v63 }
 0xcc2   :  { %6412 = vmatprep.subr.mxu0 %v7235_v51 }
 0xcc3   :  { %6413 = vmatpush3.msra.mxu0 %v7235_v51 }
 0xcc4   :  { %6414 = vmatprep.subr.mxu0 %v7253_v23 }
 0xcc5   :  { %6415 = vmatpush3.msra.mxu0 %v7253_v23 }
 0xd7a   :  { %v2599_v14 = vpop.f32.mrf.mxu1 }
 0xd7b   :  { %6405 = vmatprep.mubr.msk.f32.mxu1 %vm325_vm2, %v2599_v14 }
 0xd7c   :  { %v6397_v21 = vpop.f32.mrf.mxu1 }
 0xd7e   :  { %v2672_v22 = vpop.f32.mrf.mxu0 }
 0xd7f   :  { %6406 = vmatmul.mubr.msk.f32.vlgmr.msra.gmra.mxu1 %vm325_vm2, %v2672_v22 }
 0xd80   :  { %v6402_v42 = vpop.f32.mrf.mxu0  ;;  %6420 = vmatpush3.msra.mxu1 %v7211_v60  ;;  %6427 = vmatprep.mubr.msk.f32.mxu1 %vm85_vm0, %v7229_v45 }
 0xd81   :  { %6421 = vmatprep.subr.mxu1 %v7213_v61  ;;  %v2898_v42 = vsub.s32 7, %v6920_v17 }
 0xd82   :  { %6422 = vmatpush3.msra.mxu1 %v7213_v61 }
 0xd83   :  { %6423 = vmatprep.subr.mxu1 %v7221_v6 }
 0xd84   :  { %6424 = vmatpush3.msra.mxu1 %v7221_v6 }
 0xd85   :  { %6425 = vmatprep.subr.mxu1 %v7232_v50 }
 0xd86   :  { %6426 = vmatpush3.msra.mxu1 %v7232_v50 }
 0xd87   :  { %6428 = vmatmul.mubr.msk.f32.vlgmr.msra.gmra.mxu1 %vm85_vm0, %v7240_v16  ;;  %6441 = vmatprep.subr.mxu1 %v6806_v15 }
 0xd88   :  { %6443 = vmatprep.mubr.msk.f32.mxu1 %vm6807_vm1, %v6806_v15 }
 0xe3f   :  { %v6407_v47 = vpop.f32.mrf.mxu1 }
 0xe40   :  { %v2758_v48 = vadd.f32 %v6407_v47, %v7160_v54 }
 0xe41   :  { %v2748_v49 = vpop.f32.mrf.mxu1 }
 0xe42   :  { %v2764_v52 = vadd.f32 %v2762_v46, %v2758_v48  ;;  %v2757_v53 = vadd.f32 %v2748_v49, %v7162_v56 }
 0xe44   :  { %v7196_v55 = vadd.f32 %v6880_v10, %v2764_v52  ;;  %v2763_v57 = vadd.f32 %v2762_v46, %v2757_v53  ;;  %v7281_v46 = vrot.slane %v6757_v3, %v2898_v42  ;;  %v2813_v52 = vsub.s32 6, %v6920_v17 }
 0xe46   :  { %v7199_v58 = vadd.f32 %v6874_v9, %v2763_v57  ;;  %v2770_v59 = vsel %vm85_vm0, %v7196_v55, 0.0  ;;  %v2776_v10 = vmul.f32 %v7196_v55, %v7196_v55 }
 0xe47   :  { %2771 = vadd.xlane.f32.xlu1 %v2770_v59  ;;  %v6429_v47 = vpop.f32.mrf.mxu1 }
 0xe48   :  { %v2767_v19 = vsel %vm85_vm0, %v7199_v58, 0.0  ;;  %v2775_v54 = vmul.f32 %v7199_v58, %v7199_v58  ;;  %v2780_v9 = vsel %vm85_vm0, %v2776_v10, 0.0  ;;  %v2978_v59 = vadd.f32 %v6429_v47, %v7281_v46  ;;  %v7308_v10 = vld [vmem:[#allocation2 + $0x78] sm:$0xff] }
 0xe49   :  { %v2972_v48 = vpop.f32.mrf.mxu1 }
 0xe4a   :  { %v2777_v56 = vsel %vm85_vm0, %v2775_v54, 0.0  ;;  %v2973_v49 = vadd.f32 %v2972_v48, %v7281_v46  ;;  %v7302_v54 = vld [vmem:[#allocation2 + $0x108] sm:$0xff] }
 0xe4b   :  { %2768 = vadd.xlane.f32.xlu1 %v2767_v19  ;;  %6430 = vmatprep.subr.mxu0 %v7302_v54 }
 0xe4c   :  { %6442 = vmatpush3.xpose.msk.msra.mxu1 %vm325_vm2, %v2973_v49 }
 0xe4d   :  { %6446 = vmatprep.subr.mxu1 %v6806_v15 }
 0xe4f   :  { %2778 = vadd.xlane.f32.xlu1 %v2777_v56  ;;  %v7304_v56 = vld [vmem:[#allocation2 + $0xc0] sm:$0xff] }
 0xe53   :  { %2781 = vadd.xlane.f32.xlu1 %v2780_v9  ;;  %v7312_v9 = vld [vmem:[#allocation2 + $0x30] sm:$0xff] }
 0xed0   :  { %v2772_v25 = vpop.xlane.xlu1 %2771 }
 0xed1   :  { %v2774_v30 = vmul.f32 0.03125, %v2772_v25 }
 0xed3   :  { %v2786_v37 = vmul.f32 %v2774_v30, %v2774_v30  ;;  %v2792_v11 = vsub.f32 %v7196_v55, %v2774_v30  ;;  %v7289_v55 = vrot.slane %v6757_v3, %v2813_v52 }
 0xed4   :  { %v2769_v27 = vpop.xlane.xlu1 %2768 }
 0xed5   :  { %v2773_v28 = vmul.f32 0.03125, %v2769_v27 }
 0xed7   :  { %v2785_v33 = vmul.f32 %v2773_v28, %v2773_v28  ;;  %v2791_v2 = vsub.f32 %v7199_v58, %v2773_v28 }
 0xed8   :  { %v2779_v29 = vpop.xlane.xlu1 %2778 }
 0xed9   :  { %v2783_v34 = vmul.f32 0.03125, %v2779_v29 }
 0xedb   :  { %v2787_v35 = vsub.f32 %v2783_v34, %v2785_v33  ;;  %v7334_v33 = vld [vmem:[%s7634_s4 + $0x8] sm:$0xff] }
 0xedc   :  { %v2782_v36 = vpop.xlane.xlu1 %2781  ;;  %v7339_v34 = vrot.slane %v7334_v33, %v83_v20 }
 0xedd   :  { %v2789_v38 = vmax.f32 %v2787_v35, 0.0  ;;  %v2784_v24 = vmul.f32 0.03125, %v2782_v36 }
 0xedf   :  { %v2793_v26 = vadd.f32 1e-06, %v2789_v38  ;;  %v2788_v39 = vsub.f32 %v2784_v24, %v2786_v37 }
 0xee1   :  { %6713 = vrsqrt.f32 %v2793_v26  ;;  %v2790_v40 = vmax.f32 %v2788_v39, 0.0 }
 0xee3   :  { %v2794_v41 = vadd.f32 1e-06, %v2790_v40 }
 0xee5   :  { %6715 = vrsqrt.f32 %v2794_v41 }
 0xeee   :  { %v6714_v5 = vpop.eup %6713 }
 0xeef   :  { %v2797_v7 = vmul.f32 %v6714_v5, %v2791_v2 }
 0xef1   :  { %v2803_v12 = vmul.f32 %v2802_v4, %v2797_v7 }
 0xef2   :  { %v6716_v13 = vpop.eup %6715 }
 0xef3   :  { %v7268_v32 = vadd.f32 %v2808_v8, %v2803_v12  ;;  %v2798_v14 = vmul.f32 %v6716_v13, %v2792_v11 }
 0xef5   :  { %6416 = vmatprep.mubr.msk.f32.mxu0 %vm85_vm0, %v7268_v32  ;;  %v2804_v21 = vmul.f32 %v2802_v4, %v2798_v14 }
 0xef7   :  { %v7272_v22 = vadd.f32 %v2808_v8, %v2804_v21 }
 0xef9   :  { %6417 = vmatmul.mubr.msk.f32.vlgmr.msra.gmra.mxu0 %vm85_vm0, %v7272_v22 }
 0xefa   :  { %6438 = vmatprep.mubr.msk.f32.mxu0 %vm85_vm0, %v7229_v45  ;;  %6431 = vmatpush3.msra.mxu0 %v7302_v54 }
 0xefb   :  { %6432 = vmatprep.subr.mxu0 %v7304_v56 }
 0xefc   :  { %6433 = vmatpush3.msra.mxu0 %v7304_v56 }
 0xefd   :  { %6434 = vmatprep.subr.mxu0 %v7308_v10 }
 0xefe   :  { %6435 = vmatpush3.msra.mxu0 %v7308_v10 }
 0xeff   :  { %6436 = vmatprep.subr.mxu0 %v7312_v9 }
 0xf00   :  { %6437 = vmatpush3.msra.mxu0 %v7312_v9 }
 0xf01   :  { %6439 = vmatmul.mubr.msk.f32.vlgmr.msra.gmra.mxu0 %vm85_vm0, %v7240_v16  ;;  %6451 = vmatprep.subr.mxu0 %v6806_v15 }
 0xf02   :  { %6453 = vmatprep.mubr.msk.f32.mxu0 %vm6807_vm1, %v6806_v15 }
 0xfb9   :  { %v6418_v53 = vpop.f32.mrf.mxu0 }
 0xfba   :  { %v2893_v19 = vadd.f32 %v6418_v53, %v7289_v55 }
 0xfbb   :  { %v2887_v57 = vpop.f32.mrf.mxu0 }
 0xfbc   :  { %v2888_v58 = vadd.f32 %v2887_v57, %v7289_v55 }
 0xfbe   :  { %6444 = vmatmul.mubr.msk.f32.vlgmr.msra.gmra.mxu1 %vm325_vm2, %v2888_v58 }
 0xfbf   :  { %6447 = vmatpush3.xpose.msk.msra.mxu1 %vm325_vm2, %v2978_v59  ;;  %6448 = vmatprep.mubr.msk.f32.mxu1 %vm6807_vm1, %v6806_v15 }
 0xfc0   :  { %6456 = vmatprep.subr.mxu1 %v6806_v15 }
 0xfc1   :  { %v6440_v35 = vpop.f32.mrf.mxu0 }
 0xfc2   :  { %6449 = vmatmul.mubr.msk.f32.vlgmr.msra.gmra.mxu1 %vm325_vm2, %v2893_v19  ;;  %v3057_v36 = vadd.f32 %v6440_v35, %v7339_v34 }
 0xfc3   :  { %6458 = vmatprep.mubr.msk.f32.mxu1 %vm6807_vm1, %v6806_v15  ;;  %v3051_v37 = vpop.f32.mrf.mxu0 }
 0xfc4   :  { %6457 = vmatpush3.msra.mxu1 %v3057_v36  ;;  %v3052_v38 = vadd.f32 %v3051_v37, %v7339_v34 }
 0xfc6   :  { %6452 = vmatpush3.msra.mxu0 %v3052_v38 }
0x107e   :  { %v3132_v44 = vpop.f32.mrf.mxu1 }
0x107f   :  { %v3212_v30 = vsel %vm325_vm2, %v3132_v44, -inf }
0x1080   :  { %v6445_v25 = vpop.f32.mrf.mxu1 }
0x1082   :  { %v3208_v27 = vpop.f32.mrf.mxu1 }
0x1083   :  { %v3215_v28 = vsel %vm325_vm2, %v3208_v27, -inf }
0x1084   :  { %3216 = vmax.xlane.f32.xlu1 %v3215_v28  ;;  %v6450_v29 = vpop.f32.mrf.mxu1 }
0x1088   :  { %3213 = vmax.xlane.f32.xlu1 %v3212_v30 }
0x1099   :  { %3485 = vrot.lane.b32.xlu1 %v7211_v60, %s6808_s27 }
0x109d   :  { %3483 = vrot.lane.b32.xlu1 %v7213_v61, %s6808_s27 }
0x10a1   :  { %3390 = vrot.lane.b32.xlu1 %v7216_v62, %s6808_s27 }
0x110d   :  { %v3217_v24 = vpop.xlane.xlu1 %3216 }
0x110e   :  { %v3219_v26 = vsub.f32 %v3208_v27, %v3217_v24 }
0x1110   :  { %v3222_v39 = vmul.f32 1.442695, %v3219_v26 }
0x1111   :  { %v3214_v40 = vpop.xlane.xlu1 %3213 }
0x1112   :  { %6717 = vpow2.f32 %v3222_v39  ;;  %v3218_v41 = vsub.f32 %v3132_v44, %v3214_v40 }
0x1114   :  { %v3220_v2 = vmul.f32 1.442695, %v3218_v41 }
0x1115   :  { %v3486_v3 = vpop.permute.xlu1 %3485 }
0x1116   :  { %6719 = vpow2.f32 %v3220_v2  ;;  %6472 = vmatprep.subr.mxu1 %v3486_v3 }
0x1119   :  { %v3484_v20 = vpop.permute.xlu1 %3483 }
0x111d   :  { %v3391_v4 = vpop.permute.xlu1 %3390 }
0x111e   :  { %6461 = vmatprep.subr.mxu0 %v3391_v4 }
0x111f   :  { %v6718_v5 = vpop.eup %6717 }
0x1120   :  { %v3227_v7 = vsel %vm325_vm2, %v6718_v5, 0.0 }
0x1121   :  { %3228 = vadd.xlane.f32.xlu0 %v3227_v7 }
0x1123   :  { %v6720_v8 = vpop.eup %6719 }
0x1124   :  { %v3224_v11 = vsel %vm325_vm2, %v6720_v8, 0.0 }
0x1125   :  { %3225 = vadd.xlane.f32.xlu1 %v3224_v11 }
0x1136   :  { %3388 = vrot.lane.b32.xlu1 %v7218_v63, %s6808_s27 }
0x1137   :  { %3481 = vrot.lane.b32.xlu0 %v7221_v6, %s6808_s27 }
0x113a   :  { %3479 = vrot.lane.b32.xlu1 %v7232_v50, %s6808_s27 }
0x113b   :  { %3580 = vrot.lane.b32.xlu0 %v7302_v54, %s6808_s27 }
0x113e   :  { %3386 = vrot.lane.b32.xlu1 %v7235_v51, %s6808_s27 }
0x113f   :  { %3576 = vrot.lane.b32.xlu0 %v7308_v10, %s6808_s27 }
0x1142   :  { %3384 = vrot.lane.b32.xlu1 %v7253_v23, %s6808_s27 }
0x1146   :  { %3492 = vrot.lane.b32.xlu1 %v7281_v46, %s6808_s27 }
0x114a   :  { %3397 = vrot.lane.b32.xlu1 %v7289_v55, %s6808_s27 }
0x114e   :  { %3578 = vrot.lane.b32.xlu1 %v7304_v56, %s6808_s27 }
0x1152   :  { %3574 = vrot.lane.b32.xlu1 %v7312_v9, %s6808_s27 }
0x11aa   :  { %v3229_v12 = vpop.xlane.xlu0 %3228 }
0x11ab   :  { %6721 = vrcp.f32 %v3229_v12 }
0x11ae   :  { %v3226_v13 = vpop.xlane.xlu1 %3225  ;;  %v3482_v53 = vpop.permute.xlu0 %3481 }
0x11af   :  { %6723 = vrcp.f32 %v3226_v13 }
0x11b2   :  { %v3389_v14 = vpop.permute.xlu1 %3388  ;;  %v3581_v40 = vpop.permute.xlu0 %3580 }
0x11b6   :  { %v3480_v21 = vpop.permute.xlu1 %3479  ;;  %v3577_v2 = vpop.permute.xlu0 %3576 }
0x11b8   :  { %v6722_v47 = vpop.eup %6721 }
0x11b9   :  { %v3233_v48 = vmul.f32 %v6722_v47, %v6718_v5 }
0x11ba   :  { %v3387_v57 = vpop.permute.xlu1 %3386 }
0x11bb   :  { %6459 = vmatmul.mubr.msk.f32.vlgmr.msra.gmra.mxu1 %vm325_vm2, %v3233_v48 }
0x11bc   :  { %v6724_v49 = vpop.eup %6723  ;;  %6473 = vmatpush3.msra.mxu1 %v3486_v3  ;;  %6480 = vmatprep.mubr.msk.f32.mxu1 %vm85_vm0, %v7229_v45 }
0x11bd   :  { %6474 = vmatprep.subr.mxu1 %v3484_v20  ;;  %v3232_v58 = vmul.f32 %v6724_v49, %v6720_v8 }
0x11be   :  { %6475 = vmatpush3.msra.mxu1 %v3484_v20  ;;  %v3385_v59 = vpop.permute.xlu1 %3384 }
0x11bf   :  { %6476 = vmatprep.subr.mxu1 %v3482_v53  ;;  %6454 = vmatmul.mubr.msk.f32.vlgmr.msra.gmra.mxu0 %vm325_vm2, %v3232_v58 }
0x11c0   :  { %6462 = vmatpush3.msra.mxu0 %v3391_v4  ;;  %6477 = vmatpush3.msra.mxu1 %v3482_v53 }
0x11c1   :  { %6463 = vmatprep.subr.mxu0 %v3389_v14  ;;  %6469 = vmatprep.mubr.msk.f32.mxu0 %vm85_vm0, %v7268_v32 }
0x11c2   :  { %6478 = vmatprep.subr.mxu1 %v3480_v21  ;;  %6464 = vmatpush3.msra.mxu0 %v3389_v14  ;;  %v3493_v28 = vpop.permute.xlu1 %3492 }
0x11c3   :  { %6479 = vmatpush3.msra.mxu1 %v3480_v21  ;;  %6465 = vmatprep.subr.mxu0 %v3387_v57 }
0x11c4   :  { %6481 = vmatmul.mubr.msk.f32.vlgmr.msra.gmra.mxu1 %vm85_vm0, %v7240_v16  ;;  %6466 = vmatpush3.msra.mxu0 %v3387_v57 }
0x11c5   :  { %6467 = vmatprep.subr.mxu0 %v3385_v59  ;;  %6494 = vmatprep.subr.mxu1 %v6806_v15 }
0x11c6   :  { %6468 = vmatpush3.msra.mxu0 %v3385_v59  ;;  %6496 = vmatprep.mubr.msk.f32.mxu1 %vm6807_vm1, %v6806_v15  ;;  %v3398_v37 = vpop.permute.xlu1 %3397 }
0x11c7   :  { %6470 = vmatmul.mubr.msk.f32.vlgmr.msra.gmra.mxu0 %vm85_vm0, %v7272_v22  ;;  %6483 = vmatprep.subr.mxu0 %v3581_v40 }
0x11c8   :  { %6491 = vmatprep.mubr.msk.f32.mxu0 %vm85_vm0, %v7229_v45  ;;  %6484 = vmatpush3.msra.mxu0 %v3581_v40 }
0x11ca   :  { %v3579_v41 = vpop.permute.xlu1 %3578 }
0x11cb   :  { %6485 = vmatprep.subr.mxu0 %v3579_v41 }
0x11cc   :  { %6486 = vmatpush3.msra.mxu0 %v3579_v41 }
0x11cd   :  { %6487 = vmatprep.subr.mxu0 %v3577_v2 }
0x11ce   :  { %v3575_v3 = vpop.permute.xlu1 %3574  ;;  %6488 = vmatpush3.msra.mxu0 %v3577_v2 }
0x11cf   :  { %6489 = vmatprep.subr.mxu0 %v3575_v3 }
0x11d0   :  { %6490 = vmatpush3.msra.mxu0 %v3575_v3 }
0x11d1   :  { %6492 = vmatmul.mubr.msk.f32.vlgmr.msra.gmra.mxu0 %vm85_vm0, %v7240_v16  ;;  %6504 = vmatprep.subr.mxu0 %v6806_v15 }
0x11d2   :  { %6506 = vmatprep.mubr.msk.f32.mxu0 %vm6807_vm1, %v6806_v15 }
0x127b   :  { %v7382_v19 = vpop.f32.mrf.mxu1 }
0x127d   :  { %v6460_v44 = vpop.f32.mrf.mxu1 }
0x127f   :  { %v7384_v25 = vpop.f32.mrf.mxu0 }
0x1281   :  { %v6455_v27 = vpop.f32.mrf.mxu0 }
0x1284   :  { %v6482_v29 = vpop.f32.mrf.mxu1 }
0x1285   :  { %v3567_v26 = vadd.f32 %v6482_v29, %v3493_v28 }
0x1286   :  { %v3561_v30 = vpop.f32.mrf.mxu1 }
0x1287   :  { %v3562_v35 = vadd.f32 %v3561_v30, %v3493_v28  ;;  %v6471_v36 = vpop.f32.mrf.mxu0  ;;  %v42_v30 = vld [vmem:[#allocation2 + $0x38] sm:$0xff] }
0x1288   :  { %v3472_v39 = vadd.f32 %v6471_v36, %v3398_v37 }
0x1289   :  { %6495 = vmatpush3.xpose.msk.msra.mxu1 %vm325_vm2, %v3562_v35  ;;  %v3466_v38 = vpop.f32.mrf.mxu0  ;;  %v51_v35 = vld [vmem:[#allocation2 + $0x80] sm:$0xff] }
0x128a   :  { %v3467_v24 = vadd.f32 %v3466_v38, %v3398_v37  ;;  %6499 = vmatprep.subr.mxu1 %v6806_v15 }
0x128c   :  { %6497 = vmatmul.mubr.msk.f32.vlgmr.msra.gmra.mxu1 %vm325_vm2, %v3467_v24 }
0x128d   :  { %6500 = vmatpush3.xpose.msk.msra.mxu1 %vm325_vm2, %v3567_v26  ;;  %6501 = vmatprep.mubr.msk.f32.mxu1 %vm6807_vm1, %v6806_v15 }
0x128e   :  { %6509 = vmatprep.subr.mxu1 %v6806_v15 }
0x1290   :  { %6502 = vmatmul.mubr.msk.f32.vlgmr.msra.gmra.mxu1 %vm325_vm2, %v3472_v39 }
0x1291   :  { %6511 = vmatprep.mubr.msk.f32.mxu1 %vm6807_vm1, %v6806_v15  ;;  %v6493_v59 = vpop.f32.mrf.mxu0 }
0x1293   :  { %v3656_v28 = vpop.f32.mrf.mxu0 }
0x134c   :  { %v3737_v20 = vpop.f32.mrf.mxu1 }
0x134d   :  { %v3817_v4 = vsel %vm325_vm2, %v3737_v20, -inf }
0x134e   :  { %3818 = vmax.xlane.f32.xlu0 %v3817_v4  ;;  %v6498_v5 = vpop.f32.mrf.mxu1 }
0x1350   :  { %v3813_v7 = vpop.f32.mrf.mxu1 }
0x1351   :  { %v3820_v8 = vsel %vm325_vm2, %v3813_v7, -inf }
0x1352   :  { %3821 = vmax.xlane.f32.xlu1 %v3820_v8  ;;  %v6503_v11 = vpop.f32.mrf.mxu1 }
0x1363   :  { %3587 = vrot.lane.b32.xlu1 %v7339_v34, %s6808_s27 }
0x1367   :  { %4241 = vrot.lane.b32.xlu1 %v7213_v61, %s6809_s28 }
0x136b   :  { %4153 = vrot.lane.b32.xlu1 %v7216_v62, %s6809_s28 }
0x136f   :  { %4151 = vrot.lane.b32.xlu1 %v7218_v63, %s6809_s28 }
0x1373   :  { %4149 = vrot.lane.b32.xlu1 %v7235_v51, %s6809_s28 }
0x1377   :  { %4249 = vrot.lane.b32.xlu1 %v7281_v46, %s6809_s28 }
0x137b   :  { %4333 = vrot.lane.b32.xlu1 %v7302_v54, %s6809_s28 }
0x137f   :  { %4329 = vrot.lane.b32.xlu1 %v7308_v10, %s6809_s28 }
0x13d7   :  { %v3819_v12 = vpop.xlane.xlu0 %3818 }
0x13d8   :  { %v3823_v13 = vsub.f32 %v3737_v20, %v3819_v12 }
0x13da   :  { %v3825_v14 = vmul.f32 1.442695, %v3823_v13 }
0x13db   :  { %v3822_v21 = vpop.xlane.xlu1 %3821 }
0x13dc   :  { %6725 = vpow2.f32 %v3825_v14  ;;  %v3824_v47 = vsub.f32 %v3813_v7, %v3822_v21 }
0x13de   :  { %v3827_v48 = vmul.f32 1.442695, %v3824_v47 }
0x13df   :  { %v3588_v44 = vpop.permute.xlu1 %3587 }
0x13e0   :  { %6727 = vpow2.f32 %v3827_v48  ;;  %v3662_v27 = vadd.f32 %v6493_v59, %v3588_v44  ;;  %v3657_v29 = vadd.f32 %v3656_v28, %v3588_v44 }
0x13e2   :  { %6510 = vmatpush3.msra.mxu1 %v3662_v27  ;;  %6505 = vmatpush3.msra.mxu0 %v3657_v29 }
0x13e3   :  { %6519 = vmatprep.subr.mxu1 %v42_v30  ;;  %6514 = vmatprep.subr.mxu0 %v51_v35  ;;  %v4242_v38 = vpop.permute.xlu1 %4241 }
0x13e7   :  { %v4154_v39 = vpop.permute.xlu1 %4153 }
0x13e9   :  { %v6726_v49 = vpop.eup %6725 }
0x13ea   :  { %v3829_v53 = vsel %vm325_vm2, %v6726_v49, 0.0 }
0x13eb   :  { %3830 = vadd.xlane.f32.xlu0 %v3829_v53 }
0x13ed   :  { %v6728_v57 = vpop.eup %6727 }
0x13ee   :  { %v3832_v58 = vsel %vm325_vm2, %v6728_v57, 0.0 }
0x13ef   :  { %3833 = vadd.xlane.f32.xlu0 %v3832_v58 }
0x1405   :  { %4243 = vrot.lane.b32.xlu0 %v7211_v60, %s6809_s28 }
0x1409   :  { %4239 = vrot.lane.b32.xlu0 %v7221_v6, %s6809_s28 }
0x140d   :  { %4237 = vrot.lane.b32.xlu0 %v7232_v50, %s6809_s28 }
0x1411   :  { %4147 = vrot.lane.b32.xlu0 %v7253_v23, %s6809_s28 }
0x1415   :  { %4159 = vrot.lane.b32.xlu0 %v7289_v55, %s6809_s28 }
0x1419   :  { %4331 = vrot.lane.b32.xlu0 %v7304_v56, %s6809_s28 }
0x141d   :  { %4327 = vrot.lane.b32.xlu0 %v7312_v9, %s6809_s28 }
0x1474   :  { %v3831_v36 = vpop.xlane.xlu0 %3830 }
0x1475   :  { %6729 = vrcp.f32 %v3831_v36 }
0x1478   :  { %v3834_v37 = vpop.xlane.xlu0 %3833 }
0x1479   :  { %6731 = vrcp.f32 %v3834_v37 }
0x147c   :  { %v4244_v2 = vpop.permute.xlu0 %4243 }
0x1480   :  { %v4240_v3 = vpop.permute.xlu0 %4239 }
0x1482   :  { %v6730_v24 = vpop.eup %6729 }
0x1483   :  { %v3837_v26 = vmul.f32 %v6730_v24, %v6726_v49 }
0x1484   :  { %v4238_v20 = vpop.permute.xlu0 %4237 }
0x1485   :  { %6507 = vmatmul.mubr.msk.f32.vlgmr.msra.gmra.mxu0 %vm325_vm2, %v3837_v26 }
0x1486   :  { %v6732_v40 = vpop.eup %6731  ;;  %6515 = vmatpush3.msra.mxu0 %v51_v35 }
0x1487   :  { %v3838_v41 = vmul.f32 %v6732_v40, %v6728_v57  ;;  %6524 = vmatprep.subr.mxu0 %v4154_v39 }
0x1488   :  { %v4148_v11 = vpop.permute.xlu0 %4147 }
0x1489   :  { %6512 = vmatmul.mubr.msk.f32.vlgmr.msra.gmra.mxu1 %vm325_vm2, %v3838_v41 }
0x148a   :  { %6521 = vmatprep.mubr.msk.f32.mxu1 %vm325_vm2, %v7384_v25  ;;  %6520 = vmatpush3.msra.mxu1 %v42_v30  ;;  %v4152_v25 = vpop.permute.xlu1 %4151 }
0x148b   :  { %6535 = vmatprep.subr.mxu1 %v4244_v2 }
0x148c   :  { %v4160_v58 = vpop.permute.xlu0 %4159 }
0x148d   :  { %6522 = vmatmul.mubr.msk.f32.vlgmr.msra.gmra.mxu1 %vm325_vm2, %v7382_v19 }
0x148e   :  { %6536 = vmatpush3.msra.mxu1 %v4244_v2  ;;  %6543 = vmatprep.mubr.msk.f32.mxu1 %vm85_vm0, %v7229_v45  ;;  %v4150_v8 = vpop.permute.xlu1 %4149 }
0x148f   :  { %6537 = vmatprep.subr.mxu1 %v4242_v38 }
0x1490   :  { %6538 = vmatpush3.msra.mxu1 %v4242_v38  ;;  %v4332_v30 = vpop.permute.xlu0 %4331 }
0x1491   :  { %6539 = vmatprep.subr.mxu1 %v4240_v3 }
0x1492   :  { %6540 = vmatpush3.msra.mxu1 %v4240_v3  ;;  %v4250_v21 = vpop.permute.xlu1 %4249 }
0x1493   :  { %6541 = vmatprep.subr.mxu1 %v4238_v20 }
0x1494   :  { %6542 = vmatpush3.msra.mxu1 %v4238_v20  ;;  %v4328_v36 = vpop.permute.xlu0 %4327 }
0x1495   :  { %6544 = vmatmul.mubr.msk.f32.vlgmr.msra.gmra.mxu1 %vm85_vm0, %v7240_v16  ;;  %6557 = vmatprep.subr.mxu1 %v6806_v15 }
0x1496   :  { %6559 = vmatprep.mubr.msk.f32.mxu1 %vm6807_vm1, %v6806_v15  ;;  %v4334_v29 = vpop.permute.xlu1 %4333 }
0x149a   :  { %v4330_v35 = vpop.permute.xlu1 %4329 }
0x1545   :  { %v3908_v19 = vpop.f32.mrf.mxu0 }
0x1546   :  { %6516 = vmatprep.mubr.msk.f32.mxu0 %vm325_vm2, %v3908_v19 }
0x1547   :  { %v6508_v4 = vpop.f32.mrf.mxu0 }
0x1549   :  { %v3981_v5 = vpop.f32.mrf.mxu1 }
0x154a   :  { %6517 = vmatmul.mubr.msk.f32.vlgmr.msra.gmra.mxu0 %vm325_vm2, %v3981_v5 }
0x154b   :  { %6525 = vmatpush3.msra.mxu0 %v4154_v39  ;;  %v6513_v7 = vpop.f32.mrf.mxu1  ;;  %6532 = vmatprep.mubr.msk.f32.mxu0 %vm85_vm0, %v7268_v32 }
0x154c   :  { %6526 = vmatprep.subr.mxu0 %v4152_v25 }
0x154d   :  { %6527 = vmatpush3.msra.mxu0 %v4152_v25  ;;  %v7456_v12 = vpop.f32.mrf.mxu1 }
0x154e   :  { %6528 = vmatprep.subr.mxu0 %v4150_v8 }
0x154f   :  { %6529 = vmatpush3.msra.mxu0 %v4150_v8  ;;  %v7458_v13 = vpop.f32.mrf.mxu1 }
0x1550   :  { %6530 = vmatprep.subr.mxu0 %v4148_v11 }
0x1551   :  { %6531 = vmatpush3.msra.mxu0 %v4148_v11 }
0x1552   :  { %6533 = vmatmul.mubr.msk.f32.vlgmr.msra.gmra.mxu0 %vm85_vm0, %v7272_v22  ;;  %6546 = vmatprep.subr.mxu0 %v4334_v29 }
0x1553   :  { %6554 = vmatprep.mubr.msk.f32.mxu0 %vm85_vm0, %v7229_v45  ;;  %6547 = vmatpush3.msra.mxu0 %v4334_v29 }
0x1554   :  { %6548 = vmatprep.subr.mxu0 %v4332_v30 }
0x1555   :  { %v6545_v14 = vpop.f32.mrf.mxu1  ;;  %6549 = vmatpush3.msra.mxu0 %v4332_v30 }
0x1556   :  { %v4324_v27 = vadd.f32 %v6545_v14, %v4250_v21  ;;  %6550 = vmatprep.subr.mxu0 %v4330_v35 }
0x1557   :  { %v4318_v47 = vpop.f32.mrf.mxu1  ;;  %6551 = vmatpush3.msra.mxu0 %v4330_v35 }
0x1558   :  { %v4319_v48 = vadd.f32 %v4318_v47, %v4250_v21  ;;  %6552 = vmatprep.subr.mxu0 %v4328_v36 }
0x1559   :  { %6553 = vmatpush3.msra.mxu0 %v4328_v36 }
0x155a   :  { %6558 = vmatpush3.xpose.msk.msra.mxu1 %vm325_vm2, %v4319_v48  ;;  %6555 = vmatmul.mubr.msk.f32.vlgmr.msra.gmra.mxu0 %vm85_vm0, %v7240_v16 }
0x155b   :  { %6562 = vmatprep.subr.mxu1 %v6806_v15  ;;  %6567 = vmatprep.subr.mxu0 %v6806_v15 }
0x155c   :  { %6569 = vmatprep.mubr.msk.f32.mxu0 %vm6807_vm1, %v6806_v15 }
0x160a   :  { %v7462_v49 = vpop.f32.mrf.mxu0 }
0x160c   :  { %v7464_v53 = vpop.f32.mrf.mxu0 }
0x1612   :  { %v6534_v57 = vpop.f32.mrf.mxu0 }
0x1613   :  { %v4234_v28 = vadd.f32 %v6534_v57, %v4160_v58 }
0x1614   :  { %v4228_v59 = vpop.f32.mrf.mxu0 }
0x1615   :  { %v4229_v44 = vadd.f32 %v4228_v59, %v4160_v58 }
0x1617   :  { %6560 = vmatmul.mubr.msk.f32.vlgmr.msra.gmra.mxu1 %vm325_vm2, %v4229_v44 }
0x1618   :  { %6563 = vmatpush3.xpose.msk.msra.mxu1 %vm325_vm2, %v4324_v27  ;;  %6564 = vmatprep.mubr.msk.f32.mxu1 %vm6807_vm1, %v6806_v15 }
0x1619   :  { %6572 = vmatprep.subr.mxu1 %v6806_v15 }
0x161b   :  { %6565 = vmatmul.mubr.msk.f32.vlgmr.msra.gmra.mxu1 %vm325_vm2, %v4234_v28  ;;  %v4144_v28 = vadd.f32 %v7456_v12, %v7462_v49 }
0x161c   :  { %6574 = vmatprep.mubr.msk.f32.mxu1 %vm6807_vm1, %v6806_v15 }
0x16d7   :  { %v4489_v37 = vpop.f32.mrf.mxu1 }
0x16d8   :  { %v4569_v38 = vsel %vm325_vm2, %v4489_v37, -inf }
0x16d9   :  { %4570 = vmax.xlane.f32.xlu1 %v4569_v38  ;;  %v6561_v24 = vpop.f32.mrf.mxu1 }
0x16db   :  { %v4565_v26 = vpop.f32.mrf.mxu1 }
0x16dc   :  { %v4572_v39 = vsel %vm325_vm2, %v4565_v26, -inf }
0x16dd   :  { %4573 = vmax.xlane.f32.xlu0 %v4572_v39  ;;  %v6566_v40 = vpop.f32.mrf.mxu1 }
0x1762   :  { %v4571_v41 = vpop.xlane.xlu1 %4570 }
0x1763   :  { %v4575_v2 = vsub.f32 %v4489_v37, %v4571_v41 }
0x1765   :  { %v4577_v3 = vmul.f32 1.442695, %v4575_v2 }
0x1766   :  { %v4574_v20 = vpop.xlane.xlu0 %4573 }
0x1767   :  { %6733 = vpow2.f32 %v4577_v3  ;;  %v4576_v19 = vsub.f32 %v4565_v26, %v4574_v20 }
0x1769   :  { %v4579_v25 = vmul.f32 1.442695, %v4576_v19 }
0x176b   :  { %6735 = vpow2.f32 %v4579_v25 }
0x1774   :  { %v6734_v4 = vpop.eup %6733 }
0x1775   :  { %v4581_v5 = vsel %vm325_vm2, %v6734_v4, 0.0 }
0x1776   :  { %4582 = vadd.xlane.f32.xlu0 %v4581_v5 }
0x1778   :  { %v6736_v7 = vpop.eup %6735 }
0x1779   :  { %v4584_v8 = vsel %vm325_vm2, %v6736_v7, 0.0 }
0x177a   :  { %4585 = vadd.xlane.f32.xlu1 %v4584_v8 }
0x178b   :  { %4916 = vrot.lane.b32.xlu1 %v7211_v60, %s6810_s29  ;;  %v6556_v60 = vpop.f32.mrf.mxu0 }
0x178c   :  { %4339 = vrot.lane.b32.xlu0 %v7339_v34, %s6809_s28 }
0x178f   :  { %4914 = vrot.lane.b32.xlu1 %v7213_v61, %s6810_s29 }
0x1790   :  { %4826 = vrot.lane.b32.xlu0 %v7216_v62, %s6810_s29  ;;  %v4408_v62 = vpop.f32.mrf.mxu0 }
0x1793   :  { %4912 = vrot.lane.b32.xlu1 %v7221_v6, %s6810_s29 }
0x1794   :  { %4824 = vrot.lane.b32.xlu0 %v7218_v63, %s6810_s29 }
0x1797   :  { %4910 = vrot.lane.b32.xlu1 %v7232_v50, %s6810_s29 }
0x1798   :  { %4822 = vrot.lane.b32.xlu0 %v7235_v51, %s6810_s29 }
0x179b   :  { %4820 = vrot.lane.b32.xlu1 %v7253_v23, %s6810_s29  ;;  %v60_v23 = vld [vmem:[#allocation2 + $0xc8] sm:$0xff] }
0x179c   :  { %4922 = vrot.lane.b32.xlu0 %v7281_v46, %s6810_s29 }
0x179f   :  { %4832 = vrot.lane.b32.xlu1 %v7289_v55, %s6810_s29 }
0x17a0   :  { %5006 = vrot.lane.b32.xlu0 %v7302_v54, %s6810_s29 }
0x17a3   :  { %5004 = vrot.lane.b32.xlu1 %v7304_v56, %s6810_s29 }
0x17a4   :  { %5002 = vrot.lane.b32.xlu0 %v7308_v10, %s6810_s29 }
0x17a7   :  { %5000 = vrot.lane.b32.xlu1 %v7312_v9, %s6810_s29 }
0x17ff   :  { %v4583_v61 = vpop.xlane.xlu0 %4582 }
0x1800   :  { %6737 = vrcp.f32 %v4583_v61 }
0x1803   :  { %v4586_v63 = vpop.xlane.xlu1 %4585  ;;  %v4340_v6 = vpop.permute.xlu0 %4339 }
0x1804   :  { %6739 = vrcp.f32 %v4586_v63  ;;  %v4414_v50 = vadd.f32 %v6556_v60, %v4340_v6  ;;  %v4409_v51 = vadd.f32 %v4408_v62, %v4340_v6 }
0x1806   :  { %6568 = vmatpush3.msra.mxu0 %v4409_v51  ;;  %6573 = vmatpush3.msra.mxu1 %v4414_v50 }
0x1807   :  { %v4917_v46 = vpop.permute.xlu1 %4916  ;;  %v4827_v55 = vpop.permute.xlu0 %4826  ;;  %6577 = vmatprep.subr.mxu0 %v60_v23 }
0x1808   :  { %6582 = vmatprep.subr.mxu1 %v4827_v55 }
0x180b   :  { %v4915_v54 = vpop.permute.xlu1 %4914  ;;  %v4825_v11 = vpop.permute.xlu0 %4824 }
0x180d   :  { %v6738_v56 = vpop.eup %6737 }
0x180e   :  { %v4589_v10 = vmul.f32 %v6738_v56, %v6734_v4 }
0x180f   :  { %v4913_v9 = vpop.permute.xlu1 %4912  ;;  %v4823_v48 = vpop.permute.xlu0 %4822 }
0x1810   :  { %6570 = vmatmul.mubr.msk.f32.vlgmr.msra.gmra.mxu0 %vm325_vm2, %v4589_v10 }
0x1811   :  { %v6740_v14 = vpop.eup %6739  ;;  %6578 = vmatpush3.msra.mxu0 %v60_v23 }
0x1812   :  { %v4590_v21 = vmul.f32 %v6740_v14, %v6736_v7  ;;  %6593 = vmatprep.subr.mxu0 %v4917_v46 }
0x1813   :  { %v4911_v47 = vpop.permute.xlu1 %4910  ;;  %v4923_v24 = vpop.permute.xlu0 %4922 }
0x1814   :  { %6575 = vmatmul.mubr.msk.f32.vlgmr.msra.gmra.mxu1 %vm325_vm2, %v4590_v21 }
0x1815   :  { %6583 = vmatpush3.msra.mxu1 %v4827_v55  ;;  %6590 = vmatprep.mubr.msk.f32.mxu1 %vm85_vm0, %v7268_v32 }
0x1816   :  { %6584 = vmatprep.subr.mxu1 %v4825_v11 }
0x1817   :  { %6585 = vmatpush3.msra.mxu1 %v4825_v11  ;;  %v4821_v57 = vpop.permute.xlu1 %4820  ;;  %v5007_v49 = vpop.permute.xlu0 %5006 }
0x1818   :  { %6586 = vmatprep.subr.mxu1 %v4823_v48 }
0x1819   :  { %6587 = vmatpush3.msra.mxu1 %v4823_v48  ;;  %v69_v48 = vld [vmem:[#allocation2 + $0x110] sm:$0xff] }
0x181a   :  { %6588 = vmatprep.subr.mxu1 %v4821_v57 }
0x181b   :  { %6589 = vmatpush3.msra.mxu1 %v4821_v57  ;;  %v4833_v41 = vpop.permute.xlu1 %4832  ;;  %v5003_v3 = vpop.permute.xlu0 %5002 }
0x181c   :  { %6591 = vmatmul.mubr.msk.f32.vlgmr.msra.gmra.mxu1 %vm85_vm0, %v7272_v22  ;;  %6604 = vmatprep.subr.mxu1 %v5007_v49 }
0x181d   :  { %6612 = vmatprep.mubr.msk.f32.mxu1 %vm85_vm0, %v7229_v45  ;;  %6605 = vmatpush3.msra.mxu1 %v5007_v49  ;;  %v5638_v49 = vld [vmem:[%s7633_s3 + $0x30] sm:$0xff] }
0x18d0   :  { %v4660_v58 = vpop.f32.mrf.mxu0 }
0x18d1   :  { %6579 = vmatprep.mubr.msk.f32.mxu0 %vm325_vm2, %v4660_v58 }
0x18d2   :  { %v6571_v59 = vpop.f32.mrf.mxu0 }
0x18d4   :  { %v4733_v44 = vpop.f32.mrf.mxu1 }
0x18d5   :  { %6580 = vmatmul.mubr.msk.f32.vlgmr.msra.gmra.mxu0 %vm325_vm2, %v4733_v44 }
0x18d6   :  { %6594 = vmatpush3.msra.mxu0 %v4917_v46  ;;  %v6576_v27 = vpop.f32.mrf.mxu1  ;;  %6601 = vmatprep.mubr.msk.f32.mxu0 %vm85_vm0, %v7229_v45  ;;  %v4139_v45 = vadd.f32 %v7458_v13, %v7464_v53  ;;  %v5005_v53 = vpop.permute.xlu1 %5004 }
0x18d7   :  { %6595 = vmatprep.subr.mxu0 %v4915_v54  ;;  %6606 = vmatprep.subr.mxu1 %v5005_v53  ;;  %v5496_v27 = vrot.slane %v7334_v33, %v169_v18 }
0x18d8   :  { %6596 = vmatpush3.msra.mxu0 %v4915_v54  ;;  %6607 = vmatpush3.msra.mxu1 %v5005_v53  ;;  %v5637_v53 = vld [vmem:[%s7633_s3 + $0x28] sm:$0xff] }
0x18d9   :  { %6597 = vmatprep.subr.mxu0 %v4913_v9  ;;  %6608 = vmatprep.subr.mxu1 %v5003_v3 }
0x18da   :  { %6598 = vmatpush3.msra.mxu0 %v4913_v9  ;;  %v5001_v20 = vpop.permute.xlu1 %5000  ;;  %6609 = vmatpush3.msra.mxu1 %v5003_v3  ;;  %v5636_v3 = vld [vmem:[%s7633_s3 + $0x20] sm:$0xff] }
0x18db   :  { %6599 = vmatprep.subr.mxu0 %v4911_v47  ;;  %6610 = vmatprep.subr.mxu1 %v5001_v20 }
0x18dc   :  { %6600 = vmatpush3.msra.mxu0 %v4911_v47  ;;  %v6592_v37 = vpop.f32.mrf.mxu1  ;;  %6611 = vmatpush3.msra.mxu1 %v5001_v20 }
0x18dd   :  { %6602 = vmatmul.mubr.msk.f32.vlgmr.msra.gmra.mxu0 %vm85_vm0, %v7240_v16  ;;  %6615 = vmatprep.subr.mxu0 %v6806_v15  ;;  %v4907_v13 = vadd.f32 %v6592_v37, %v4833_v41 }
0x18de   :  { %6617 = vmatprep.mubr.msk.f32.mxu0 %vm6807_vm1, %v6806_v15  ;;  %v4901_v39 = vpop.f32.mrf.mxu1  ;;  %6613 = vmatmul.mubr.msk.f32.vlgmr.msra.gmra.mxu1 %vm85_vm0, %v7240_v16 }
0x18df   :  { %v4902_v2 = vadd.f32 %v4901_v39, %v4833_v41  ;;  %6625 = vmatprep.subr.mxu1 %v6806_v15  ;;  %6627 = vmatprep.mubr.msk.f32.mxu1 %vm6807_vm1, %v6806_v15 }
0x1995   :  { %v6581_v29 = vpop.f32.mrf.mxu0 }
0x1996   :  { %v7534_v30 = vadd.f32 %v6581_v29, %v4144_v28 }
0x1997   :  { %v4809_v35 = vpop.f32.mrf.mxu0 }
0x1998   :  { %v7536_v36 = vadd.f32 %v4809_v35, %v4139_v45 }
0x199d   :  { %v6603_v38 = vpop.f32.mrf.mxu0 }
0x199e   :  { %v4997_v12 = vadd.f32 %v6603_v38, %v4923_v24  ;;  %v6614_v46 = vpop.f32.mrf.mxu1 }
0x199f   :  { %v4991_v26 = vpop.f32.mrf.mxu0 }
0x19a0   :  { %v4992_v40 = vadd.f32 %v4991_v26, %v4923_v24 }
0x19a2   :  { %6616 = vmatpush3.xpose.msk.msra.mxu0 %vm325_vm2, %v4992_v40 }
0x19a3   :  { %6620 = vmatprep.subr.mxu0 %v6806_v15 }
0x19a5   :  { %6618 = vmatmul.mubr.msk.f32.vlgmr.msra.gmra.mxu0 %vm325_vm2, %v4902_v2  ;;  %v61_v2 = vld [vmem:[#allocation2 + $0xd0] sm:$0xff] }
0x19a6   :  { %6621 = vmatpush3.xpose.msk.msra.mxu0 %vm325_vm2, %v4997_v12  ;;  %6622 = vmatprep.mubr.msk.f32.mxu0 %vm6807_vm1, %v6806_v15  ;;  %v43_v12 = vld [vmem:[#allocation2 + $0x40] sm:$0xff] }
0x19a7   :  { %6630 = vmatprep.subr.mxu0 %v6806_v15 }
0x19a9   :  { %6623 = vmatmul.mubr.msk.f32.vlgmr.msra.gmra.mxu0 %vm325_vm2, %v4907_v13  ;;  %v5639_v13 = vld [vmem:[%s7633_s3 + $0x38] sm:$0xff] }
0x19aa   :  { %6632 = vmatprep.mubr.msk.f32.mxu0 %vm6807_vm1, %v6806_v15 }
0x1a65   :  { %v5162_v19 = vpop.f32.mrf.mxu0 }
0x1a66   :  { %v5242_v25 = vsel %vm325_vm2, %v5162_v19, -inf }
0x1a67   :  { %5243 = vmax.xlane.f32.xlu0 %v5242_v25  ;;  %v6619_v4 = vpop.f32.mrf.mxu0 }
0x1a69   :  { %v5238_v5 = vpop.f32.mrf.mxu0 }
0x1a6a   :  { %v5245_v7 = vsel %vm325_vm2, %v5238_v5, -inf }
0x1a6b   :  { %5246 = vmax.xlane.f32.xlu1 %v5245_v7  ;;  %v6624_v8 = vpop.f32.mrf.mxu0 }
0x1a7c   :  { %5012 = vrot.lane.b32.xlu1 %v7339_v34, %s6810_s29  ;;  %v5081_v34 = vpop.f32.mrf.mxu1 }
0x1af0   :  { %v5244_v60 = vpop.xlane.xlu0 %5243 }
0x1af1   :  { %v5248_v16 = vsub.f32 %v5162_v19, %v5244_v60 }
0x1af3   :  { %v5250_v61 = vmul.f32 1.442695, %v5248_v16 }
0x1af4   :  { %v5247_v62 = vpop.xlane.xlu1 %5246 }
0x1af5   :  { %6741 = vpow2.f32 %v5250_v61  ;;  %v5249_v63 = vsub.f32 %v5238_v5, %v5247_v62 }
0x1af7   :  { %v5252_v15 = vmul.f32 1.442695, %v5249_v63 }
0x1af8   :  { %v5013_v55 = vpop.permute.xlu1 %5012 }
0x1af9   :  { %6743 = vpow2.f32 %v5252_v15  ;;  %v5087_v54 = vadd.f32 %v6614_v46, %v5013_v55  ;;  %v5082_v56 = vadd.f32 %v5081_v34, %v5013_v55  ;;  %v5536_v46 = vrot.slane %v7334_v33, %v248_v31  ;;  %v5635_v31 = vld [vmem:[%s7633_s3 + $0x18] sm:$0xff] }
0x1afb   :  { %6631 = vmatpush3.msra.mxu0 %v5087_v54  ;;  %6626 = vmatpush3.msra.mxu1 %v5082_v56  ;;  %v5542_v54 = vrot.slane %v7334_v33, %v2761_v43  ;;  %v5634_v43 = vld [vmem:[%s7633_s3 + $0x10] sm:$0xff]  ;;  %v5633_v33 = vld [vmem:[%s7633_s3 + $0x8] sm:$0xff] }
0x1afc   :  { %6635 = vmatprep.subr.mxu1 %v69_v48 }
0x1b02   :  { %v6742_v6 = vpop.eup %6741 }
0x1b03   :  { %v5254_v50 = vsel %vm325_vm2, %v6742_v6, 0.0 }
0x1b04   :  { %5255 = vadd.xlane.f32.xlu0 %v5254_v50 }
0x1b06   :  { %v6744_v51 = vpop.eup %6743 }
0x1b07   :  { %v5257_v23 = vsel %vm325_vm2, %v6744_v51, 0.0 }
0x1b08   :  { %5258 = vadd.xlane.f32.xlu0 %v5257_v23 }
0x1b8d   :  { %v5256_v10 = vpop.xlane.xlu0 %5255 }
0x1b8e   :  { %6745 = vrcp.f32 %v5256_v10 }
0x1b91   :  { %v5259_v9 = vpop.xlane.xlu0 %5258 }
0x1b92   :  { %6747 = vrcp.f32 %v5259_v9 }
0x1b9b   :  { %v6746_v11 = vpop.eup %6745 }
0x1b9c   :  { %v5262_v14 = vmul.f32 %v6746_v11, %v6742_v6 }
0x1b9e   :  { %6628 = vmatmul.mubr.msk.f32.vlgmr.msra.gmra.mxu1 %vm325_vm2, %v5262_v14 }
0x1b9f   :  { %v6748_v21 = vpop.eup %6747  ;;  %6636 = vmatpush3.msra.mxu1 %v69_v48  ;;  %v5632_v48 = vld [vmem:[%s7633_s3] sm:$0xff]  ;;  %s6811_s3 = smov [#allocation5]  }
0x1ba0   :  { %v5263_v47 = vmul.f32 %v6748_v21, %v6744_v51  ;;  %6651 = vmatprep.subr.mxu1 %v5639_v13 }
0x1ba2   :  { %6633 = vmatmul.mubr.msk.f32.vlgmr.msra.gmra.mxu0 %vm325_vm2, %v5263_v47 }
0x1c5e   :  { %v5333_v57 = vpop.f32.mrf.mxu1 }
0x1c5f   :  { %6637 = vmatprep.mubr.msk.f32.mxu1 %vm325_vm2, %v5333_v57  ;;  %v6758_v57 = vld [vmem:[%s7634_s4 + $0x8] sm:$0xff]  ;;  %s5788_s4 = sshll.u32 %s6811_s3, 4  ;;  %s5789_s4 = int_to_ptr.vmem [resolvable:$true] %s5788_s4 }
0x1c60   :  { %v6629_v58 = vpop.f32.mrf.mxu1  ;;  %s6779_s26 = scalar_lea.vmem %s5789_s4, 128  ;;  %p6784_p6 = scmp.lt.s32.totalorder %s5789_s4, %s5789_s4 }
0x1c61   :  { %v5548_v58 = vrot.slane %v6758_v57, %v2801_v0  ;;  %p6780_p5 = scmp.ne.s32.totalorder %s5789_s4, %s6779_s26  ;;  %p6785_p7 = scmp.lt.s32.totalorder %s6779_s26, %s6779_s26 }
0x1c62   :  { %v5406_v59 = vpop.f32.mrf.mxu0 }
0x1c63   :  { %6638 = vmatmul.mubr.msk.f32.vlgmr.msra.gmra.mxu1 %vm325_vm2, %v5406_v59  ;;  %p6786_p8 = por %p6785_p7, %p6784_p6 }
0x1c64   :  { %v6634_v44 = vpop.f32.mrf.mxu0  ;;  %6652 = vmatpush3.msra.mxu1 %v5639_v13 }
0x1c65   :  { %6653 = vmatprep.subr.mxu1 %v5638_v49  ;;  %p6787_p9 = pnand %p6786_p8, %p6780_p5 }
0x1c66   :  { %6654 = vmatpush3.msra.mxu1 %v5638_v49 }
0x1c67   :  { %6655 = vmatprep.subr.mxu1 %v5637_v53 }
0x1c68   :  { %6656 = vmatpush3.msra.mxu1 %v5637_v53 }
0x1c69   :  { %6657 = vmatprep.subr.mxu1 %v5636_v3 }
0x1c6a   :  { %6658 = vmatpush3.msra.mxu1 %v5636_v3 }
0x1c6b   :  { %6659 = vmatprep.subr.mxu1 %v5635_v31 }
0x1c6c   :  { %6660 = vmatpush3.msra.mxu1 %v5635_v31 }
0x1c6d   :  { %6661 = vmatprep.subr.mxu1 %v5634_v43 }
0x1c6e   :  { %6662 = vmatpush3.msra.mxu1 %v5634_v43 }
0x1c6f   :  { %6663 = vmatprep.subr.mxu1 %v5633_v33 }
0x1c70   :  { %6664 = vmatpush3.msra.mxu1 %v5633_v33 }
0x1c71   :  { %6665 = vmatprep.subr.mxu1 %v5632_v48 }
0x1c72   :  { %6666 = vmatpush3.msra.mxu1 %v5632_v48 }
0x1d23   :  { %v6639_v28 = vpop.f32.mrf.mxu1 }
0x1d24   :  { %v5492_v29 = vadd.f32 %v6639_v28, %v7534_v30 }
0x1d25   :  { %v5482_v45 = vpop.f32.mrf.mxu1 }
0x1d26   :  { %v5498_v35 = vadd.f32 %v5496_v27, %v5492_v29  ;;  %v5491_v37 = vadd.f32 %v5482_v45, %v7536_v36  ;;  %v70_v36 = vld [vmem:[#allocation2 + $0x118] sm:$0xff] }
0x1d27   :  { %6640 = vmatprep.subr.mxu0 %v70_v36 }
0x1d28   :  { %v7569_v38 = vadd.f32 %v5498_v35, %v7272_v22  ;;  %v5497_v24 = vadd.f32 %v5496_v27, %v5491_v37  ;;  %6641 = vmatpush3.msra.mxu0 %v70_v36  ;;  %v5643_v35 = vrot.slane %v6758_v57, %v2807_v1 }
0x1d29   :  { %6642 = vmatprep.subr.mxu0 %v61_v2 }
0x1d2a   :  { %v5499_v26 = vadd.f32 %v5497_v24, %v7268_v32  ;;  %v5504_v39 = vsel %vm85_vm0, %v7569_v38, 0.0  ;;  %v5510_v41 = vmul.f32 %v7569_v38, %v7569_v38  ;;  %v52_v32 = vld [vmem:[#allocation2 + $0x88] sm:$0xff]  ;;  %6643 = vmatpush3.msra.mxu0 %v61_v2 }
0x1d2b   :  { %5505 = vadd.xlane.f32.xlu0 %v5504_v39  ;;  %6644 = vmatprep.subr.mxu0 %v52_v32 }
0x1d2c   :  { %v5501_v40 = vsel %vm85_vm0, %v5499_v26, 0.0  ;;  %v5509_v18 = vmul.f32 %v5499_v26, %v5499_v26  ;;  %v5514_v22 = vsel %vm85_vm0, %v5510_v41, 0.0  ;;  %6645 = vmatpush3.msra.mxu0 %v52_v32 }
0x1d2d   :  { %6646 = vmatprep.subr.mxu0 %v43_v12 }
0x1d2e   :  { %v5511_v30 = vsel %vm85_vm0, %v5509_v18, 0.0  ;;  %6647 = vmatpush3.msra.mxu0 %v43_v12 }
0x1d2f   :  { %5502 = vadd.xlane.f32.xlu0 %v5501_v40 }
0x1d33   :  { %5512 = vadd.xlane.f32.xlu0 %v5511_v30 }
0x1d37   :  { %5515 = vadd.xlane.f32.xlu0 %v5514_v22 }
0x1db4   :  { %v5506_v20 = vpop.xlane.xlu0 %5505 }
0x1db5   :  { %v5508_v5 = vmul.f32 0.03125, %v5506_v20 }
0x1db7   :  { %v5520_v61 = vmul.f32 %v5508_v5, %v5508_v5  ;;  %v5526_v56 = vsub.f32 %v7569_v38, %v5508_v5 }
0x1db8   :  { %v5503_v19 = vpop.xlane.xlu0 %5502 }
0x1db9   :  { %v5507_v25 = vmul.f32 0.03125, %v5503_v19 }
0x1dbb   :  { %v5519_v7 = vmul.f32 %v5507_v25, %v5507_v25  ;;  %v5525_v23 = vsub.f32 %v5499_v26, %v5507_v25 }
0x1dbc   :  { %v5513_v4 = vpop.xlane.xlu0 %5512 }
0x1dbd   :  { %v5517_v8 = vmul.f32 0.03125, %v5513_v4 }
0x1dbf   :  { %v5521_v60 = vsub.f32 %v5517_v8, %v5519_v7 }
0x1dc0   :  { %v5516_v16 = vpop.xlane.xlu0 %5515 }
0x1dc1   :  { %v5523_v62 = vmax.f32 %v5521_v60, 0.0  ;;  %v5518_v63 = vmul.f32 0.03125, %v5516_v16  ;;  %v5763_v16 = vrot.slane %v6758_v57, %v2813_v52 }
0x1dc3   :  { %v5527_v15 = vadd.f32 1e-06, %v5523_v62  ;;  %v5522_v6 = vsub.f32 %v5518_v63, %v5520_v61 }
0x1dc5   :  { %6749 = vrsqrt.f32 %v5527_v15  ;;  %v5524_v50 = vmax.f32 %v5522_v6, 0.0  ;;  %v5769_v15 = vrot.slane %v6758_v57, %v2898_v42 }
0x1dc7   :  { %v5528_v51 = vadd.f32 1e-06, %v5524_v50 }
0x1dc9   :  { %6751 = vrsqrt.f32 %v5528_v51 }
0x1dd2   :  { %v6750_v55 = vpop.eup %6749 }
0x1dd3   :  { %v5531_v34 = vmul.f32 %v6750_v55, %v5525_v23 }
0x1dd5   :  { %v5537_v10 = vmul.f32 %v5536_v46, %v5531_v34 }
0x1dd6   :  { %v6752_v9 = vpop.eup %6751 }
0x1dd7   :  { %v5532_v11 = vmul.f32 %v6752_v9, %v5526_v56  ;;  %v5543_v14 = vadd.f32 %v5542_v54, %v5537_v10 }
0x1dd9   :  { %v5538_v21 = vmul.f32 %v5536_v46, %v5532_v11  ;;  %6648 = vmatprep.mubr.msk.f32.mxu0 %vm85_vm0, %v5543_v14 }
0x1ddb   :  { %v5544_v47 = vadd.f32 %v5542_v54, %v5538_v21 }
0x1ddd   :  { %6649 = vmatmul.mubr.msk.f32.vlgmr.msra.gmra.mxu0 %vm85_vm0, %v5544_v47 }
0x1e9d   :  { %v6650_v59 = vpop.f32.mrf.mxu0 }
0x1e9e   :  { %v5627_v44 = vadd.f32 %v6650_v59, %v5548_v58 }
0x1e9f   :  { %v5621_v27 = vpop.f32.mrf.mxu0 }
0x1ea0   :  { %v5622_v28 = vadd.f32 %v5621_v27, %v5548_v58  ;;  %v5631_v45 = vmax.f32 %v5627_v44, 0.0 }
0x1ea2   :  { %v5630_v29 = vmax.f32 %v5622_v28, 0.0 }
0x1ea4   :  { %6667 = vmatprep.mubr.msk.f32.mxu1 %vm5644_vm3, %v5630_v29 }
0x1ea5   :  { %6668 = vmatmul.mubr.msk.f32.vlgmr.msra.gmra.mxu1 %vm5644_vm3, %v5631_v45 }
0x1f65   :  { %v6669_v37 = vpop.f32.mrf.mxu1 }
0x1f66   :  { %v5723_v38 = vadd.f32 %v6669_v37, %v5643_v35 }
0x1f67   :  { %v5717_v24 = vpop.f32.mrf.mxu1 }
0x1f68   :  { %v5727_v26 = vadd.f32 %v5723_v38, %v5544_v47  ;;  %v5718_v39 = vadd.f32 %v5717_v24, %v5643_v35 }
0x1f6a   :  { %v5726_v40 = vadd.f32 %v5718_v39, %v5543_v14  ;;  %v5731_v0 = vsel %vm85_vm0, %v5727_v26, 0.0  ;;  %v5737_v22 = vmul.f32 %v5727_v26, %v5727_v26 }
0x1f6b   :  { %5732 = vadd.xlane.f32.xlu1 %v5731_v0 }
0x1f6c   :  { %v5728_v18 = vsel %vm85_vm0, %v5726_v40, 0.0  ;;  %v5736_v30 = vmul.f32 %v5726_v40, %v5726_v40  ;;  %v5741_v36 = vsel %vm85_vm0, %v5737_v22, 0.0 }
0x1f6d   :  { %5729 = vadd.xlane.f32.xlu0 %v5728_v18 }
0x1f6e   :  { %v5738_v41 = vsel %vm85_vm0, %v5736_v30, 0.0 }
0x1f71   :  { %5739 = vadd.xlane.f32.xlu0 %v5738_v41 }
0x1f75   :  { %5742 = vadd.xlane.f32.xlu0 %v5741_v36 }
0x1ff4   :  { %v5733_v32 = vpop.xlane.xlu1 %5732 }
0x1ff5   :  { %v5735_v13 = vmul.f32 0.03125, %v5733_v32 }
0x1ff6   :  { %v5730_v1 = vpop.xlane.xlu0 %5729 }
0x1ff7   :  { %v5734_v2 = vmul.f32 0.03125, %v5730_v1  ;;  %v5747_v19 = vmul.f32 %v5735_v13, %v5735_v13  ;;  %v5753_v6 = vsub.f32 %v5727_v26, %v5735_v13 }
0x1ff9   :  { %v5746_v49 = vmul.f32 %v5734_v2, %v5734_v2  ;;  %v5752_v61 = vsub.f32 %v5726_v40, %v5734_v2 }
0x1ffa   :  { %v5740_v12 = vpop.xlane.xlu0 %5739 }
0x1ffb   :  { %v5744_v53 = vmul.f32 0.03125, %v5740_v12 }
0x1ffd   :  { %v5748_v3 = vsub.f32 %v5744_v53, %v5746_v49 }
0x1ffe   :  { %v5743_v20 = vpop.xlane.xlu0 %5742 }
0x1fff   :  { %v5750_v25 = vmax.f32 %v5748_v3, 0.0  ;;  %v5745_v4 = vmul.f32 0.03125, %v5743_v20 }
0x2001   :  { %v5754_v5 = vadd.f32 1e-06, %v5750_v25  ;;  %v5749_v7 = vsub.f32 %v5745_v4, %v5747_v19 }
0x2003   :  { %6753 = vrsqrt.f32 %v5754_v5  ;;  %v5751_v8 = vmax.f32 %v5749_v7, 0.0 }
0x2005   :  { %v5755_v60 = vadd.f32 1e-06, %v5751_v8 }
0x2007   :  { %6755 = vrsqrt.f32 %v5755_v60 }
0x2010   :  { %v6754_v62 = vpop.eup %6753 }
0x2011   :  { %v5758_v63 = vmul.f32 %v6754_v62, %v5752_v61 }
0x2013   :  { %v5764_v50 = vmul.f32 %v5763_v16, %v5758_v63 }
0x2014   :  { %v6756_v51 = vpop.eup %6755 }
0x2015   :  { %v5759_v23 = vmul.f32 %v6756_v51, %v5753_v6  ;;  %v5770_v46 = vadd.f32 %v5769_v15, %v5764_v50 }
0x2017   :  { %v5765_v55 = vmul.f32 %v5763_v16, %v5759_v23  ;;  %v5918_v54 = vpack.c.bf16 %v5770_v46, %v5770_v46 }
0x2019   :  { %v5771_v34 = vadd.f32 %v5769_v15, %v5765_v55  ;;  %5781 = vst.msk [vmem:[#allocation5] sm:$0xf] %vm5780_vm4, %v5918_v54 }
0x201b   :  { %v5919_v52 = vpack.c.bf16 %v5771_v34, %v5771_v34 }
0x201d   :  { %5782 = vst.msk [vmem:[#allocation5 + $0x4] sm:$0xf] %vm5780_vm4, %v5919_v52 }
0x201e   :  { %6790 = shalt.err (!%p6787_p9)
}
0x201f   :  { %s6812_s27 = smov 64   ;;  %s6813_s28 = smov 4  }
0x2020   :  { %5794 = dma.vmem_to_hbm [thread:$0]  %s5789_s4, 128, %s7635_s5, [#allocation4], %s6812_s27, %s6812_s27, %s6813_s28  }
0x2021   :  { %6801 = dma.done.wait [#allocation4], 128  }
0x2022   :  { %6802 = vsyncadd [#allocation4], 4294967168 }
0x2023   :  { %5798 = vsyncpa [#allocation3], 1 }
0x2024   :  { %5799 = vsyncpa [#allocation4], 1 }

</bundles_post_ra>
